<compile_context>
chip_gen: v6e
topology: v6e:2x2x1
jax: 0.10.0
libtpu: 0.0.40
codegen_flags: <defaults>
</compile_context>

<pallas_src>
import functools

import jax
import jax.numpy as jnp
from jax.experimental import pallas as pl
from jax.experimental.pallas import tpu as pltpu

HIDDEN = 512
LANE = 128


def _round_up(x, m):
    return ((x + m - 1) // m) * m


def _pick_batch_tile(batch):
    """Largest tile in {512, 256, 128} (or the 8-padded batch if smaller)
    that minimizes padded rows; ties go to the larger tile."""
    b8 = _round_up(batch, 8)
    if b8 <= 128:
        return b8
    best_tm, best_padded = None, None
    for cand in (512, 256, 128):
        padded = _round_up(batch, cand)
        if best_padded is None or padded < best_padded:
            best_tm, best_padded = cand, padded
    return best_tm


def _mlp_kernel(x_ref, w1_ref, b1_ref, w2_ref, b2_ref, w3_ref, b3_ref,
                w4_ref, b4_ref, o_ref):
    # Layer 1: Linear(latent_dim, 512) + ReLU   (bf16 MXU, f32 accumulate)
    h = jnp.dot(x_ref[...].astype(jnp.bfloat16), w1_ref[...],
                preferred_element_type=jnp.float32)
    h = jnp.maximum(h + b1_ref[...], 0.0)
    # Layer 2: Linear(512, 512) + ReLU
    h = jnp.dot(h.astype(jnp.bfloat16), w2_ref[...],
                preferred_element_type=jnp.float32)
    h = jnp.maximum(h + b2_ref[...], 0.0)
    # Layer 3: Linear(512, 512) + ReLU
    h = jnp.dot(h.astype(jnp.bfloat16), w3_ref[...],
                preferred_element_type=jnp.float32)
    h = jnp.maximum(h + b3_ref[...], 0.0)
    # Output head: Linear(512, out_dim_padded), no activation
    out = jnp.dot(h.astype(jnp.bfloat16), w4_ref[...],
                  preferred_element_type=jnp.float32)
    o_ref[...] = (out + b4_ref[...]).astype(o_ref.dtype)


@functools.partial(jax.jit, static_argnames=("tm",))
def global_decoder_pallas(x, params, *, tm=None):
    """x: (B, latent_dim) f32.  params: dict of f32 weights/biases, (in, out) layout."""
    B, latent = x.shape
    out_dim = params["w4"].shape[1]
    out_p = _round_up(out_dim, LANE)          # lane-dense output block

    if tm is None:
        tm = _pick_batch_tile(B)
    b_p = _round_up(B, tm)

    x_p = jnp.pad(x, ((0, b_p - B), (0, 0))) if b_p != B else x

    # One-time weight cast to bf16 (halves weight DMA, ~2x MXU rate on v6e/v7x).
    w1 = params["w1"].astype(jnp.bfloat16)
    w2 = params["w2"].astype(jnp.bfloat16)
    w3 = params["w3"].astype(jnp.bfloat16)
    w4 = params["w4"]
    b4 = params["b4"]
    if out_p != out_dim:                       # zero-pad head columns to 128 lanes
        w4 = jnp.pad(w4, ((0, 0), (0, out_p - out_dim)))
        b4 = jnp.pad(b4, ((0, 0), (0, out_p - out_dim)))
    w4 = w4.astype(jnp.bfloat16)
    b1, b2, b3 = params["b1"], params["b2"], params["b3"]   # biases stay f32

    # Grid-invariant (resident) spec: weights/biases DMA'd once, reused each step.
    def resident(arr):
        return pl.BlockSpec(arr.shape, lambda i: (0, 0))

    flops = 2 * b_p * (latent * HIDDEN + 2 * HIDDEN * HIDDEN + HIDDEN * out_p)
    bytes_accessed = (
        x_p.size * 4
        + (w1.size + w2.size + w3.size + w4.size) * 2
        + (b1.size + b2.size + b3.size + b4.size) * 4
        + b_p * out_p * 4)

    out = pl.pallas_call(
        _mlp_kernel,
        out_shape=jax.ShapeDtypeStruct((b_p, out_p), x.dtype),
        grid=(b_p // tm,),
        in_specs=[
            pl.BlockSpec((tm, latent), lambda i: (i, 0)),   # x tile (pipelined)
            resident(w1), resident(b1),
            resident(w2), resident(b2),
            resident(w3), resident(b3),
            resident(w4), resident(b4),
        ],
        out_specs=pl.BlockSpec((tm, out_p), lambda i: (i, 0)),
        compiler_params=pltpu.CompilerParams(
            dimension_semantics=("parallel",)),
        cost_estimate=pl.CostEstimate(
            flops=flops, transcendentals=0, bytes_accessed=bytes_accessed),
    )(x_p, w1, b1, w2, b2, w3, b3, w4, b4)

    return out[:B, :out_dim]


def global_decoder_ref(x, params):
    """Pure-f32 reference (matches the PyTorch module semantics)."""
    h = jnp.maximum(x @ params["w1"] + params["b1"], 0.0)
    h = jnp.maximum(h @ params["w2"] + params["b2"], 0.0)
    h = jnp.maximum(h @ params["w3"] + params["b3"], 0.0)
    return h @ params["w4"] + params["b4"]


def global_decoder_ref_bf16(x, params):
    """Reference that mirrors the kernel's bf16-operand / f32-accumulate math."""
    def mm(a, w):
        return jnp.dot(a.astype(jnp.bfloat16), w.astype(jnp.bfloat16),
                       preferred_element_type=jnp.float32)
    h = jnp.maximum(mm(x, params["w1"]) + params["b1"], 0.0)
    h = jnp.maximum(mm(h, params["w2"]) + params["b2"], 0.0)
    h = jnp.maximum(mm(h, params["w3"]) + params["b3"], 0.0)
    return mm(h, params["w4"]) + params["b4"]


def init_params(key, latent_dim, out_dim):
    """Deterministic synthetic init (PyTorch-Linear-style uniform fan-in scale)."""
    ks = jax.random.split(key, 8)
    dims = [(latent_dim, HIDDEN), (HIDDEN, HIDDEN), (HIDDEN, HIDDEN), (HIDDEN, out_dim)]
    params = {}
    for i, (fan_in, fan_out) in enumerate(dims, start=1):
        bound = 1.0 / (fan_in ** 0.5)
        params[f"w{i}"] = jax.random.uniform(
            ks[2 * (i - 1)], (fan_in, fan_out), jnp.float32, -bound, bound)
        # biases kept 2D (1, fan_out) so they broadcast cleanly in-kernel
        params[f"b{i}"] = jax.random.uniform(
            ks[2 * (i - 1) + 1], (1, fan_out), jnp.float32, -bound, bound)
    return params


if __name__ == "__main__":
    key = jax.random.PRNGKey(0)
    k_x, k_p, k_x2 = jax.random.split(key, 3)

    batch, latent_dim, out_dim = 8, 32, 64
    x = jax.random.normal(k_x, (batch, latent_dim), jnp.float32)
    params = init_params(k_p, latent_dim, out_dim)

    # Small-batch run (single grid step).
    out = jax.block_until_ready(global_decoder_pallas(x, params))
    assert out.shape == (batch, out_dim)
    assert jnp.allclose(out, global_decoder_ref_bf16(x, params), atol=5e-3, rtol=5e-3), \
        "mismatch vs bf16-accurate reference"
    assert jnp.allclose(out, global_decoder_ref(x, params), atol=5e-2, rtol=5e-2), \
        "mismatch vs f32 reference"

    # Larger, non-tile-multiple batch exercises the grid + batch/out padding path.
    batch2 = 1040
    x2 = jax.random.normal(k_x2, (batch2, latent_dim), jnp.float32)
    out2 = jax.block_until_ready(global_decoder_pallas(x2, params))
    assert out2.shape == (batch2, out_dim)
    assert jnp.allclose(out2, global_decoder_ref_bf16(x2, params), atol=5e-3, rtol=5e-3), \
        "mismatch vs bf16-accurate reference (tiled batch)"
    assert jnp.allclose(out2, global_decoder_ref(x2, params), atol=5e-2, rtol=5e-2), \
        "mismatch vs f32 reference (tiled batch)"

    print("KERNEL_OK")
</pallas_src>

<mosaic_0001>
module attributes {stable_mosaic.version = 11 : i64} {
  func.func @_mlp_kernel(%arg0: i32, %arg1: memref<8x32xf32, #tpu.memory_space<vmem>>, %arg2: memref<32x512xbf16, #tpu.memory_space<vmem>>, %arg3: memref<1x512xf32, #tpu.memory_space<vmem>>, %arg4: memref<512x512xbf16, #tpu.memory_space<vmem>>, %arg5: memref<1x512xf32, #tpu.memory_space<vmem>>, %arg6: memref<512x512xbf16, #tpu.memory_space<vmem>>, %arg7: memref<1x512xf32, #tpu.memory_space<vmem>>, %arg8: memref<512x128xbf16, #tpu.memory_space<vmem>>, %arg9: memref<1x128xf32, #tpu.memory_space<vmem>>, %arg10: memref<8x128xf32, #tpu.memory_space<vmem>>) attributes {dimension_semantics = [#tpu.dimension_semantics<parallel>], iteration_bounds = array<i64: 1>, scalar_prefetch = 0 : i64, scratch_operands = 0 : i64, tpu.core_type = #tpu.core_type<tc>, window_params = [{transform_indices = @transform_0, window_bounds = array<i64: 8, 32>}, {pipeline_mode = #tpu.pipeline_mode<synchronous>, transform_indices = @transform_1, window_bounds = array<i64: 32, 512>}, {pipeline_mode = #tpu.pipeline_mode<synchronous>, transform_indices = @transform_2, window_bounds = array<i64: 1, 512>}, {pipeline_mode = #tpu.pipeline_mode<synchronous>, transform_indices = @transform_3, window_bounds = array<i64: 512, 512>}, {pipeline_mode = #tpu.pipeline_mode<synchronous>, transform_indices = @transform_4, window_bounds = array<i64: 1, 512>}, {pipeline_mode = #tpu.pipeline_mode<synchronous>, transform_indices = @transform_5, window_bounds = array<i64: 512, 512>}, {pipeline_mode = #tpu.pipeline_mode<synchronous>, transform_indices = @transform_6, window_bounds = array<i64: 1, 512>}, {pipeline_mode = #tpu.pipeline_mode<synchronous>, transform_indices = @transform_7, window_bounds = array<i64: 512, 128>}, {pipeline_mode = #tpu.pipeline_mode<synchronous>, transform_indices = @transform_8, window_bounds = array<i64: 1, 128>}, {transform_indices = @transform_9, window_bounds = array<i64: 8, 128>}]} {
    %c0 = arith.constant 0 : index
    %c0_0 = arith.constant 0 : index
    %0 = vector.load %arg1[%c0, %c0_0] : memref<8x32xf32, #tpu.memory_space<vmem>>, vector<8x32xf32>
    %1 = arith.truncf %0 : vector<8x32xf32> to vector<8x32xbf16>
    %c0_1 = arith.constant 0 : index
    %c0_2 = arith.constant 0 : index
    %2 = vector.load %arg2[%c0_1, %c0_2] : memref<32x512xbf16, #tpu.memory_space<vmem>>, vector<32x512xbf16>
    %cst = arith.constant dense<0.000000e+00> : vector<8x512xf32>
    %3 = tpu.matmul %1, %2, %cst {dimension_numbers = #tpu.dot_dimension_numbers<[1], [0], [0], [1], [0, 0, 1, 1], [], []>} : vector<8x32xbf16>, vector<32x512xbf16>, vector<8x512xf32> -> vector<8x512xf32>
    %c0_3 = arith.constant 0 : index
    %c0_4 = arith.constant 0 : index
    %4 = vector.load %arg3[%c0_3, %c0_4] : memref<1x512xf32, #tpu.memory_space<vmem>>, vector<1x512xf32>
    %5 = vector.broadcast %4 : vector<1x512xf32> to vector<8x512xf32>
    %6 = arith.addf %3, %5 : vector<8x512xf32>
    %cst_5 = arith.constant 0.000000e+00 : f32
    %7 = vector.broadcast %cst_5 : f32 to vector<8x512xf32>
    %8 = arith.maximumf %6, %7 : vector<8x512xf32>
    %9 = arith.truncf %8 : vector<8x512xf32> to vector<8x512xbf16>
    %c0_6 = arith.constant 0 : index
    %c0_7 = arith.constant 0 : index
    %10 = vector.load %arg4[%c0_6, %c0_7] : memref<512x512xbf16, #tpu.memory_space<vmem>>, vector<512x512xbf16>
    %cst_8 = arith.constant dense<0.000000e+00> : vector<8x512xf32>
    %11 = tpu.matmul %9, %10, %cst_8 {dimension_numbers = #tpu.dot_dimension_numbers<[1], [0], [0], [1], [0, 0, 1, 1], [], []>} : vector<8x512xbf16>, vector<512x512xbf16>, vector<8x512xf32> -> vector<8x512xf32>
    %c0_9 = arith.constant 0 : index
    %c0_10 = arith.constant 0 : index
    %12 = vector.load %arg5[%c0_9, %c0_10] : memref<1x512xf32, #tpu.memory_space<vmem>>, vector<1x512xf32>
    %13 = vector.broadcast %12 : vector<1x512xf32> to vector<8x512xf32>
    %14 = arith.addf %11, %13 : vector<8x512xf32>
    %cst_11 = arith.constant 0.000000e+00 : f32
    %15 = vector.broadcast %cst_11 : f32 to vector<8x512xf32>
    %16 = arith.maximumf %14, %15 : vector<8x512xf32>
    %17 = arith.truncf %16 : vector<8x512xf32> to vector<8x512xbf16>
    %c0_12 = arith.constant 0 : index
    %c0_13 = arith.constant 0 : index
    %18 = vector.load %arg6[%c0_12, %c0_13] : memref<512x512xbf16, #tpu.memory_space<vmem>>, vector<512x512xbf16>
    %cst_14 = arith.constant dense<0.000000e+00> : vector<8x512xf32>
    %19 = tpu.matmul %17, %18, %cst_14 {dimension_numbers = #tpu.dot_dimension_numbers<[1], [0], [0], [1], [0, 0, 1, 1], [], []>} : vector<8x512xbf16>, vector<512x512xbf16>, vector<8x512xf32> -> vector<8x512xf32>
    %c0_15 = arith.constant 0 : index
    %c0_16 = arith.constant 0 : index
    %20 = vector.load %arg7[%c0_15, %c0_16] : memref<1x512xf32, #tpu.memory_space<vmem>>, vector<1x512xf32>
    %21 = vector.broadcast %20 : vector<1x512xf32> to vector<8x512xf32>
    %22 = arith.addf %19, %21 : vector<8x512xf32>
    %cst_17 = arith.constant 0.000000e+00 : f32
    %23 = vector.broadcast %cst_17 : f32 to vector<8x512xf32>
    %24 = arith.maximumf %22, %23 : vector<8x512xf32>
    %25 = arith.truncf %24 : vector<8x512xf32> to vector<8x512xbf16>
    %c0_18 = arith.constant 0 : index
    %c0_19 = arith.constant 0 : index
    %26 = vector.load %arg8[%c0_18, %c0_19] : memref<512x128xbf16, #tpu.memory_space<vmem>>, vector<512x128xbf16>
    %cst_20 = arith.constant dense<0.000000e+00> : vector<8x128xf32>
    %27 = tpu.matmul %25, %26, %cst_20 {dimension_numbers = #tpu.dot_dimension_numbers<[1], [0], [0], [1], [0, 0, 1, 1], [], []>} : vector<8x512xbf16>, vector<512x128xbf16>, vector<8x128xf32> -> vector<8x128xf32>
    %c0_21 = arith.constant 0 : index
    %c0_22 = arith.constant 0 : index
    %28 = vector.load %arg9[%c0_21, %c0_22] : memref<1x128xf32, #tpu.memory_space<vmem>>, vector<1x128xf32>
    %29 = vector.broadcast %28 : vector<1x128xf32> to vector<8x128xf32>
    %30 = arith.addf %27, %29 : vector<8x128xf32>
    %c0_23 = arith.constant 0 : index
    %c0_24 = arith.constant 0 : index
    %31 = vector.load %arg10[%c0_23, %c0_24] : memref<8x128xf32, #tpu.memory_space<vmem>>, vector<8x128xf32>
    tpu.vector_store %arg10[%c0_23, %c0_24], %30 {strides = array<i32>} : memref<8x128xf32, #tpu.memory_space<vmem>>, vector<8x128xf32>,
    return
  }
  func.func @transform_0(%arg0: i32) -> (i32, i32) {
    %c0_i32 = arith.constant 0 : i32
    %c0_i32_0 = arith.constant 0 : i32
    return %arg0, %c0_i32 : i32, i32
  }
  func.func @transform_1(%arg0: i32) -> (i32, i32) {
    %c0_i32 = arith.constant 0 : i32
    %c0_i32_0 = arith.constant 0 : i32
    %c0_i32_1 = arith.constant 0 : i32
    return %c0_i32, %c0_i32_0 : i32, i32
  }
  func.func @transform_2(%arg0: i32) -> (i32, i32) {
    %c0_i32 = arith.constant 0 : i32
    %c0_i32_0 = arith.constant 0 : i32
    %c0_i32_1 = arith.constant 0 : i32
    return %c0_i32, %c0_i32_0 : i32, i32
  }
  func.func @transform_3(%arg0: i32) -> (i32, i32) {
    %c0_i32 = arith.constant 0 : i32
    %c0_i32_0 = arith.constant 0 : i32
    %c0_i32_1 = arith.constant 0 : i32
    return %c0_i32, %c0_i32_0 : i32, i32
  }
  func.func @transform_4(%arg0: i32) -> (i32, i32) {
    %c0_i32 = arith.constant 0 : i32
    %c0_i32_0 = arith.constant 0 : i32
    %c0_i32_1 = arith.constant 0 : i32
    return %c0_i32, %c0_i32_0 : i32, i32
  }
  func.func @transform_5(%arg0: i32) -> (i32, i32) {
    %c0_i32 = arith.constant 0 : i32
    %c0_i32_0 = arith.constant 0 : i32
    %c0_i32_1 = arith.constant 0 : i32
    return %c0_i32, %c0_i32_0 : i32, i32
  }
  func.func @transform_6(%arg0: i32) -> (i32, i32) {
    %c0_i32 = arith.constant 0 : i32
    %c0_i32_0 = arith.constant 0 : i32
    %c0_i32_1 = arith.constant 0 : i32
    return %c0_i32, %c0_i32_0 : i32, i32
  }
  func.func @transform_7(%arg0: i32) -> (i32, i32) {
    %c0_i32 = arith.constant 0 : i32
    %c0_i32_0 = arith.constant 0 : i32
    %c0_i32_1 = arith.constant 0 : i32
    return %c0_i32, %c0_i32_0 : i32, i32
  }
  func.func @transform_8(%arg0: i32) -> (i32, i32) {
    %c0_i32 = arith.constant 0 : i32
    %c0_i32_0 = arith.constant 0 : i32
    %c0_i32_1 = arith.constant 0 : i32
    return %c0_i32, %c0_i32_0 : i32, i32
  }
  func.func @transform_9(%arg0: i32) -> (i32, i32) {
    %c0_i32 = arith.constant 0 : i32
    %c0_i32_0 = arith.constant 0 : i32
    return %arg0, %c0_i32 : i32, i32
  }
}

</mosaic_0001>

<bundles_post_ra>
// kernel: global_decoder_pallas.1
= control target key start
LH: loop header
LB: loop body
LE: loop exit
PB: predicated region body
PF: predicated region fallthrough
CT: control target
= control target key end

     0   :  { %v3277_v2 = vmov 0   ;;  %vm106_vm0 = vcmask 261120   ;;  %s4277_s0 = inlined_call_operand.vmem [shape: f32[8,32], index: 0, kind: input, shape index: {}]   ;;  %s4278_s1 = inlined_call_operand.vmem [shape: bf16[32,512], index: 1, kind: input, shape index: {}]   ;;  %s4279_s2 = inlined_call_operand.vmem [shape: f32[1,512], index: 2, kind: input, shape index: {}]   ;;  %s4280_s3 = inlined_call_operand.vmem [shape: bf16[512,512], index: 3, kind: input, shape index: {}]   ;;  %s4281_s4 = inlined_call_operand.vmem [shape: f32[1,512], index: 4, kind: input, shape index: {}]   ;;  %s4282_s5 = inlined_call_operand.vmem [shape: bf16[512,512], index: 5, kind: input, shape index: {}]   ;;  %s4283_s6 = inlined_call_operand.vmem [shape: f32[1,512], index: 6, kind: input, shape index: {}]   ;;  %s4284_s7 = inlined_call_operand.vmem [shape: bf16[512,128], index: 7, kind: input, shape index: {}]   ;;  %s4285_s8 = inlined_call_operand.vmem [shape: f32[1,128], index: 8, kind: input, shape index: {}]   ;;  %s4286_s9 = inlined_call_operand.hbm [shape: f32[8,128], index: 9, kind: output, shape index: {}]  }
   0x1   :  { %v2827_v0 = vld [vmem:[%s4278_s1 + $0x24] ss:$16 sps:$4 sm:$0xff]   ;;  %v2829_v1 = vld [vmem:[%s4278_s1 + $0x2c] ss:$16 sps:$4 sm:$0xff]   ;;  %142 = vmatprep.mubr.bf16.mxu0 %v3277_v2  ;;  %183 = vmatprep.mubr.bf16.mxu1 %v3277_v2  ;;  %v2831_v3 = vld [vmem:[%s4278_s1 + $0x20] ss:$16 sps:$4 sm:$0xff]  }
   0x2   :  { %122 = vmatprep.subr.bf16.mxu0 %v2827_v0  ;;  %v2832_v4 = vld [vmem:[%s4278_s1 + $0x28] ss:$16 sps:$4 sm:$0xff]   ;;  %163 = vmatprep.subr.bf16.mxu1 %v2829_v1  ;;  %v2833_v5 = vld [vmem:[%s4278_s1 + $0x4] ss:$16 sps:$4 sm:$0xff]   ;;  %v2835_v6 = vld [vmem:[%s4278_s1 + $0xc] ss:$16 sps:$4 sm:$0xff]  }
   0x3   :  { %123 = vmatpush1.bf16.msra.mxu0 %v2831_v3  ;;  %164 = vmatpush1.bf16.msra.mxu1 %v2832_v4  ;;  %v2837_v7 = vld [vmem:[%s4278_s1] ss:$16 sps:$4 sm:$0xff]   ;;  %v2838_v8 = vld [vmem:[%s4278_s1 + $0x8] ss:$16 sps:$4 sm:$0xff]   ;;  %v2841_v11 = vld [vmem:[%s4280_s3 + $0xe4] ss:$16 sps:$4 sm:$0xff]  }
   0x4   :  { %124 = vmatprep.subr.bf16.mxu0 %v2833_v5  ;;  %v34_v9 = vld [vmem:[%s4277_s0] sm:$0xff]  ;;  %165 = vmatprep.subr.bf16.mxu1 %v2835_v6 }
   0x5   :  { %v2839_v10 = vld [vmem:[%s4280_s3 + $0xe0] ss:$16 sps:$4 sm:$0xff]   ;;  %v35_v12 = vpack.c.bf16 %v34_v9, %v34_v9  ;;  %v2844_v14 = vld [vmem:[%s4280_s3 + $0x2e4] ss:$16 sps:$4 sm:$0xff]  }
   0x6   :  { %v2842_v13 = vld [vmem:[%s4280_s3 + $0x2e0] ss:$16 sps:$4 sm:$0xff]   ;;  %v2847_v15 = vld [vmem:[%s4280_s3 + $0xc4] ss:$16 sps:$4 sm:$0xff]  }
   0x7   :  { %125 = vmatpush1.bf16.msra.mxu0 %v2837_v7  ;;  %166 = vmatpush1.bf16.msra.mxu1 %v2838_v8  ;;  %v2850_v16 = vld [vmem:[%s4280_s3 + $0x2c4] ss:$16 sps:$4 sm:$0xff]   ;;  %v2845_v17 = vld [vmem:[%s4280_s3 + $0xc0] ss:$16 sps:$4 sm:$0xff]  }
   0x8   :  { %990 = vmatprep.subr.bf16.mxu0 %v2841_v11  ;;  %1031 = vmatprep.subr.bf16.mxu1 %v2844_v14  ;;  %v2848_v18 = vld [vmem:[%s4280_s3 + $0x2c0] ss:$16 sps:$4 sm:$0xff]   ;;  %v2853_v19 = vld [vmem:[%s4280_s3 + $0xa4] ss:$16 sps:$4 sm:$0xff]   ;;  %v2937_v11 = vld [vmem:[%s4280_s3 + $0xec] ss:$16 sps:$4 sm:$0xff]  }
   0x9   :  { %v2856_v20 = vld [vmem:[%s4280_s3 + $0x2a4] ss:$16 sps:$4 sm:$0xff]   ;;  %v2851_v21 = vld [vmem:[%s4280_s3 + $0xa0] ss:$16 sps:$4 sm:$0xff]  }
   0xa   :  { %2490 = vmatmul.mubr.msk.bf16.vlgmr.msra.gmra.mxu0 %vm106_vm0, %v35_v12  ;;  %2491 = vmatmul.mubr.msk.bf16.vlgmr.msra.gmra.mxu1 %vm106_vm0, %v35_v12  ;;  %v2854_v22 = vld [vmem:[%s4280_s3 + $0x2a0] ss:$16 sps:$4 sm:$0xff]   ;;  %v2859_v23 = vld [vmem:[%s4280_s3 + $0x84] ss:$16 sps:$4 sm:$0xff]   ;;  %v2940_v12 = vld [vmem:[%s4280_s3 + $0x2ec] ss:$16 sps:$4 sm:$0xff]  }
   0xb   :  { %991 = vmatpush1.bf16.msra.mxu0 %v2839_v10  ;;  %1032 = vmatpush1.bf16.msra.mxu1 %v2842_v13  ;;  %v2862_v24 = vld [vmem:[%s4280_s3 + $0x284] ss:$16 sps:$4 sm:$0xff]   ;;  %v2857_v25 = vld [vmem:[%s4280_s3 + $0x80] ss:$16 sps:$4 sm:$0xff]  }
   0xc   :  { %992 = vmatprep.subr.bf16.mxu0 %v2847_v15  ;;  %1033 = vmatprep.subr.bf16.mxu1 %v2850_v16  ;;  %v2860_v26 = vld [vmem:[%s4280_s3 + $0x280] ss:$16 sps:$4 sm:$0xff]   ;;  %v2865_v27 = vld [vmem:[%s4280_s3 + $0x64] ss:$16 sps:$4 sm:$0xff]  }
   0xd   :  { %v2868_v28 = vld [vmem:[%s4280_s3 + $0x264] ss:$16 sps:$4 sm:$0xff]   ;;  %v2863_v29 = vld [vmem:[%s4280_s3 + $0x60] ss:$16 sps:$4 sm:$0xff]  }
   0xe   :  { %v2866_v30 = vld [vmem:[%s4280_s3 + $0x260] ss:$16 sps:$4 sm:$0xff]   ;;  %v2871_v31 = vld [vmem:[%s4280_s3 + $0x44] ss:$16 sps:$4 sm:$0xff]  }
   0xf   :  { %993 = vmatpush1.bf16.msra.mxu0 %v2845_v17  ;;  %1034 = vmatpush1.bf16.msra.mxu1 %v2848_v18  ;;  %v2874_v32 = vld [vmem:[%s4280_s3 + $0x244] ss:$16 sps:$4 sm:$0xff]   ;;  %v2869_v33 = vld [vmem:[%s4280_s3 + $0x40] ss:$16 sps:$4 sm:$0xff]  }
  0x10   :  { %994 = vmatprep.subr.bf16.mxu0 %v2853_v19  ;;  %1035 = vmatprep.subr.bf16.mxu1 %v2856_v20  ;;  %v2872_v34 = vld [vmem:[%s4280_s3 + $0x240] ss:$16 sps:$4 sm:$0xff]   ;;  %v2877_v35 = vld [vmem:[%s4280_s3 + $0x24] ss:$16 sps:$4 sm:$0xff]  }
  0x11   :  { %v2880_v36 = vld [vmem:[%s4280_s3 + $0x224] ss:$16 sps:$4 sm:$0xff]   ;;  %v2875_v37 = vld [vmem:[%s4280_s3 + $0x20] ss:$16 sps:$4 sm:$0xff]  }
  0x12   :  { %v2878_v38 = vld [vmem:[%s4280_s3 + $0x220] ss:$16 sps:$4 sm:$0xff]   ;;  %v2883_v39 = vld [vmem:[%s4280_s3 + $0x4] ss:$16 sps:$4 sm:$0xff]  }
  0x13   :  { %995 = vmatpush1.bf16.msra.mxu0 %v2851_v21  ;;  %1036 = vmatpush1.bf16.msra.mxu1 %v2854_v22  ;;  %v2886_v40 = vld [vmem:[%s4280_s3 + $0x204] ss:$16 sps:$4 sm:$0xff]   ;;  %v2881_v41 = vld [vmem:[%s4280_s3] ss:$16 sps:$4 sm:$0xff]  }
  0x14   :  { %996 = vmatprep.subr.bf16.mxu0 %v2859_v23  ;;  %1037 = vmatprep.subr.bf16.mxu1 %v2862_v24  ;;  %v2884_v42 = vld [vmem:[%s4280_s3 + $0x200] ss:$16 sps:$4 sm:$0xff]   ;;  %v2889_v43 = vld [vmem:[%s4280_s3 + $0x1e4] ss:$16 sps:$4 sm:$0xff]  }
  0x15   :  { %v2892_v44 = vld [vmem:[%s4280_s3 + $0x3e4] ss:$16 sps:$4 sm:$0xff]   ;;  %v2887_v45 = vld [vmem:[%s4280_s3 + $0x1e0] ss:$16 sps:$4 sm:$0xff]  }
  0x16   :  { %v2890_v46 = vld [vmem:[%s4280_s3 + $0x3e0] ss:$16 sps:$4 sm:$0xff]   ;;  %v2895_v47 = vld [vmem:[%s4280_s3 + $0x1c4] ss:$16 sps:$4 sm:$0xff]  }
  0x17   :  { %997 = vmatpush1.bf16.msra.mxu0 %v2857_v25  ;;  %1038 = vmatpush1.bf16.msra.mxu1 %v2860_v26  ;;  %v2898_v48 = vld [vmem:[%s4280_s3 + $0x3c4] ss:$16 sps:$4 sm:$0xff]   ;;  %v2893_v49 = vld [vmem:[%s4280_s3 + $0x1c0] ss:$16 sps:$4 sm:$0xff]  }
  0x18   :  { %998 = vmatprep.subr.bf16.mxu0 %v2865_v27  ;;  %1039 = vmatprep.subr.bf16.mxu1 %v2868_v28  ;;  %v2896_v50 = vld [vmem:[%s4280_s3 + $0x3c0] ss:$16 sps:$4 sm:$0xff]   ;;  %v2901_v51 = vld [vmem:[%s4280_s3 + $0x1a4] ss:$16 sps:$4 sm:$0xff]  }
  0x19   :  { %v2904_v52 = vld [vmem:[%s4280_s3 + $0x3a4] ss:$16 sps:$4 sm:$0xff]   ;;  %v2899_v53 = vld [vmem:[%s4280_s3 + $0x1a0] ss:$16 sps:$4 sm:$0xff]  }
  0x1a   :  { %v2902_v54 = vld [vmem:[%s4280_s3 + $0x3a0] ss:$16 sps:$4 sm:$0xff]   ;;  %v2907_v55 = vld [vmem:[%s4280_s3 + $0x184] ss:$16 sps:$4 sm:$0xff]  }
  0x1b   :  { %999 = vmatpush1.bf16.msra.mxu0 %v2863_v29  ;;  %1040 = vmatpush1.bf16.msra.mxu1 %v2866_v30  ;;  %v2910_v56 = vld [vmem:[%s4280_s3 + $0x384] ss:$16 sps:$4 sm:$0xff]   ;;  %v2905_v57 = vld [vmem:[%s4280_s3 + $0x180] ss:$16 sps:$4 sm:$0xff]  }
  0x1c   :  { %1000 = vmatprep.subr.bf16.mxu0 %v2871_v31  ;;  %1041 = vmatprep.subr.bf16.mxu1 %v2874_v32  ;;  %v2908_v58 = vld [vmem:[%s4280_s3 + $0x380] ss:$16 sps:$4 sm:$0xff]   ;;  %v2913_v59 = vld [vmem:[%s4280_s3 + $0x164] ss:$16 sps:$4 sm:$0xff]  }
  0x1d   :  { %v2916_v60 = vld [vmem:[%s4280_s3 + $0x364] ss:$16 sps:$4 sm:$0xff]   ;;  %v2911_v61 = vld [vmem:[%s4280_s3 + $0x160] ss:$16 sps:$4 sm:$0xff]  }
  0x1e   :  { %v2914_v62 = vld [vmem:[%s4280_s3 + $0x360] ss:$16 sps:$4 sm:$0xff]   ;;  %v2919_v63 = vld [vmem:[%s4280_s3 + $0x144] ss:$16 sps:$4 sm:$0xff]  }
  0x1f   :  { %1001 = vmatpush1.bf16.msra.mxu0 %v2869_v33  ;;  %1042 = vmatpush1.bf16.msra.mxu1 %v2872_v34  ;;  %v2922_v0 = vld [vmem:[%s4280_s3 + $0x344] ss:$16 sps:$4 sm:$0xff]   ;;  %v2917_v1 = vld [vmem:[%s4280_s3 + $0x140] ss:$16 sps:$4 sm:$0xff]  }
  0x20   :  { %1002 = vmatprep.subr.bf16.mxu0 %v2877_v35  ;;  %1043 = vmatprep.subr.bf16.mxu1 %v2880_v36  ;;  %v2920_v2 = vld [vmem:[%s4280_s3 + $0x340] ss:$16 sps:$4 sm:$0xff]   ;;  %v2925_v3 = vld [vmem:[%s4280_s3 + $0x124] ss:$16 sps:$4 sm:$0xff]  }
  0x21   :  { %v2928_v4 = vld [vmem:[%s4280_s3 + $0x324] ss:$16 sps:$4 sm:$0xff]   ;;  %v2923_v5 = vld [vmem:[%s4280_s3 + $0x120] ss:$16 sps:$4 sm:$0xff]  }
  0x22   :  { %v2926_v6 = vld [vmem:[%s4280_s3 + $0x320] ss:$16 sps:$4 sm:$0xff]   ;;  %v2931_v7 = vld [vmem:[%s4280_s3 + $0x104] ss:$16 sps:$4 sm:$0xff]  }
  0x23   :  { %1003 = vmatpush1.bf16.msra.mxu0 %v2875_v37  ;;  %1044 = vmatpush1.bf16.msra.mxu1 %v2878_v38  ;;  %v2934_v8 = vld [vmem:[%s4280_s3 + $0x304] ss:$16 sps:$4 sm:$0xff]   ;;  %v2929_v9 = vld [vmem:[%s4280_s3 + $0x100] ss:$16 sps:$4 sm:$0xff]  }
  0x24   :  { %1004 = vmatprep.subr.bf16.mxu0 %v2883_v39  ;;  %1045 = vmatprep.subr.bf16.mxu1 %v2886_v40  ;;  %v2932_v10 = vld [vmem:[%s4280_s3 + $0x300] ss:$16 sps:$4 sm:$0xff]  }
  0x27   :  { %1005 = vmatpush1.bf16.msra.mxu0 %v2881_v41  ;;  %1046 = vmatpush1.bf16.msra.mxu1 %v2884_v42 }
  0x28   :  { %1006 = vmatprep.subr.bf16.mxu0 %v2889_v43  ;;  %1047 = vmatprep.subr.bf16.mxu1 %v2892_v44 }
  0x2b   :  { %1007 = vmatpush2.bf16.msra.mxu0 %v2887_v45  ;;  %1048 = vmatpush2.bf16.msra.mxu1 %v2890_v46 }
  0x2c   :  { %1008 = vmatprep.subr.bf16.mxu0 %v2895_v47  ;;  %1049 = vmatprep.subr.bf16.mxu1 %v2898_v48 }
  0x2f   :  { %1009 = vmatpush2.bf16.msra.mxu0 %v2893_v49  ;;  %1050 = vmatpush2.bf16.msra.mxu1 %v2896_v50 }
  0x30   :  { %1010 = vmatprep.subr.bf16.mxu0 %v2901_v51  ;;  %1051 = vmatprep.subr.bf16.mxu1 %v2904_v52 }
  0x33   :  { %1011 = vmatpush2.bf16.msra.mxu0 %v2899_v53  ;;  %1052 = vmatpush2.bf16.msra.mxu1 %v2902_v54 }
  0x34   :  { %1012 = vmatprep.subr.bf16.mxu0 %v2907_v55  ;;  %1053 = vmatprep.subr.bf16.mxu1 %v2910_v56 }
  0x37   :  { %1013 = vmatpush2.bf16.msra.mxu0 %v2905_v57  ;;  %1054 = vmatpush2.bf16.msra.mxu1 %v2908_v58 }
  0x38   :  { %1014 = vmatprep.subr.bf16.mxu0 %v2913_v59  ;;  %1055 = vmatprep.subr.bf16.mxu1 %v2916_v60 }
  0x3b   :  { %1015 = vmatpush2.bf16.msra.mxu0 %v2911_v61  ;;  %1056 = vmatpush2.bf16.msra.mxu1 %v2914_v62 }
  0x3c   :  { %1016 = vmatprep.subr.bf16.mxu0 %v2919_v63  ;;  %1057 = vmatprep.subr.bf16.mxu1 %v2922_v0 }
  0x3f   :  { %1017 = vmatpush2.bf16.msra.mxu0 %v2917_v1  ;;  %1058 = vmatpush2.bf16.msra.mxu1 %v2920_v2 }
  0x40   :  { %1018 = vmatprep.subr.bf16.mxu0 %v2925_v3  ;;  %1059 = vmatprep.subr.bf16.mxu1 %v2928_v4 }
  0x43   :  { %1019 = vmatpush2.bf16.msra.mxu0 %v2923_v5  ;;  %1060 = vmatpush2.bf16.msra.mxu1 %v2926_v6 }
  0x44   :  { %1020 = vmatprep.subr.bf16.mxu0 %v2931_v7  ;;  %1061 = vmatprep.subr.bf16.mxu1 %v2934_v8 }
  0x47   :  { %1021 = vmatpush2.bf16.msra.mxu0 %v2929_v9  ;;  %1062 = vmatpush2.bf16.msra.mxu1 %v2932_v10 }
  0x48   :  { %1072 = vmatprep.subr.bf16.mxu0 %v2937_v11  ;;  %1113 = vmatprep.subr.bf16.mxu1 %v2940_v12 }
  0x49   :  { %14 = vsyncpa [#allocation3], 0  ;;  %v46_v13 = vlaneseq  ;;  %v44_v17 = vld [vmem:[%s4279_s2] sm:$0xf]  ;;  %v2935_v43 = vld [vmem:[%s4280_s3 + $0xe8] ss:$16 sps:$4 sm:$0xff]  }
  0x4a   :  { %v2938_v44 = vld [vmem:[%s4280_s3 + $0x2e8] ss:$16 sps:$4 sm:$0xff]   ;;  %v2943_v46 = vld [vmem:[%s4280_s3 + $0xcc] ss:$16 sps:$4 sm:$0xff]   ;;  %s3278_s16 = smov [#allocation2]  }
  0x4b   :  { %v47_v14 = vshrl.u32 %v46_v13, 7  ;;  %v2946_v47 = vld [vmem:[%s4280_s3 + $0x2cc] ss:$16 sps:$4 sm:$0xff]   ;;  %v2941_v48 = vld [vmem:[%s4280_s3 + $0xc8] ss:$16 sps:$4 sm:$0xff]   ;;  %s2474_s17 = sshll.u32 %s3278_s16, 4  ;;  %s2475_s17 = int_to_ptr.vmem [resolvable:$true] %s2474_s17 }
  0x4c   :  { %v2944_v49 = vld [vmem:[%s4280_s3 + $0x2c8] ss:$16 sps:$4 sm:$0xff]   ;;  %v2949_v50 = vld [vmem:[%s4280_s3 + $0xac] ss:$16 sps:$4 sm:$0xff]   ;;  %s3255_s18 = scalar_lea.vmem %s2475_s17, 128  ;;  %p3260_p1 = scmp.lt.s32.totalorder %s2475_s17, %s2475_s17 }
  0x4d   :  { %v3554_v15 = vsub.s32 0, %v47_v14  ;;  %v3556_v16 = vsub.s32 2, %v47_v14  ;;  %v3561_v18 = vsub.s32 1, %v47_v14  ;;  %v3563_v19 = vsub.s32 3, %v47_v14  ;;  %v2952_v51 = vld [vmem:[%s4280_s3 + $0x2ac] ss:$16 sps:$4 sm:$0xff]   ;;  %p3256_p0 = scmp.ne.s32.totalorder %s2475_s17, %s3255_s18  ;;  %p3261_p2 = scmp.lt.s32.totalorder %s3255_s18, %s3255_s18 }
  0x4e   :  { %v2947_v52 = vld [vmem:[%s4280_s3 + $0xa8] ss:$16 sps:$4 sm:$0xff]   ;;  %v2955_v54 = vld [vmem:[%s4280_s3 + $0x8c] ss:$16 sps:$4 sm:$0xff]  }
  0x4f   :  { %v49_v20 = vrot.slane %v44_v17, %v3554_v15  ;;  %v57_v21 = vrot.slane %v44_v17, %v3556_v16  ;;  %v53_v22 = vrot.slane %v44_v17, %v3561_v18  ;;  %v61_v23 = vrot.slane %v44_v17, %v3563_v19  ;;  %v2950_v53 = vld [vmem:[%s4280_s3 + $0x2a8] ss:$16 sps:$4 sm:$0xff]   ;;  %v2958_v55 = vld [vmem:[%s4280_s3 + $0x28c] ss:$16 sps:$4 sm:$0xff]   ;;  %p3262_p3 = por %p3261_p2, %p3260_p1 }
  0x50   :  { %v2953_v56 = vld [vmem:[%s4280_s3 + $0x88] ss:$16 sps:$4 sm:$0xff]   ;;  %v2961_v58 = vld [vmem:[%s4280_s3 + $0x6c] ss:$16 sps:$4 sm:$0xff]  }
  0x51   :  { %v2956_v57 = vld [vmem:[%s4280_s3 + $0x288] ss:$16 sps:$4 sm:$0xff]   ;;  %v2964_v59 = vld [vmem:[%s4280_s3 + $0x26c] ss:$16 sps:$4 sm:$0xff]   ;;  %p3263_p4 = pnand %p3262_p3, %p3256_p0 }
  0x52   :  { %v2959_v60 = vld [vmem:[%s4280_s3 + $0x68] ss:$16 sps:$4 sm:$0xff]   ;;  %v2967_v62 = vld [vmem:[%s4280_s3 + $0x4c] ss:$16 sps:$4 sm:$0xff]  }
  0x53   :  { %v2962_v61 = vld [vmem:[%s4280_s3 + $0x268] ss:$16 sps:$4 sm:$0xff]   ;;  %v2970_v63 = vld [vmem:[%s4280_s3 + $0x24c] ss:$16 sps:$4 sm:$0xff]  }
  0x54   :  { %v2965_v0 = vld [vmem:[%s4280_s3 + $0x48] ss:$16 sps:$4 sm:$0xff]   ;;  %v2973_v2 = vld [vmem:[%s4280_s3 + $0x2c] ss:$16 sps:$4 sm:$0xff]  }
  0x55   :  { %v2968_v1 = vld [vmem:[%s4280_s3 + $0x248] ss:$16 sps:$4 sm:$0xff]   ;;  %v2976_v3 = vld [vmem:[%s4280_s3 + $0x22c] ss:$16 sps:$4 sm:$0xff]  }
  0x56   :  { %v2971_v4 = vld [vmem:[%s4280_s3 + $0x28] ss:$16 sps:$4 sm:$0xff]   ;;  %v2979_v6 = vld [vmem:[%s4280_s3 + $0xc] ss:$16 sps:$4 sm:$0xff]  }
  0x57   :  { %v2974_v5 = vld [vmem:[%s4280_s3 + $0x228] ss:$16 sps:$4 sm:$0xff]   ;;  %v2982_v7 = vld [vmem:[%s4280_s3 + $0x20c] ss:$16 sps:$4 sm:$0xff]  }
  0x58   :  { %v2977_v8 = vld [vmem:[%s4280_s3 + $0x8] ss:$16 sps:$4 sm:$0xff]   ;;  %v2985_v10 = vld [vmem:[%s4280_s3 + $0x1ec] ss:$16 sps:$4 sm:$0xff]  }
  0x59   :  { %v2980_v9 = vld [vmem:[%s4280_s3 + $0x208] ss:$16 sps:$4 sm:$0xff]   ;;  %v2988_v11 = vld [vmem:[%s4280_s3 + $0x3ec] ss:$16 sps:$4 sm:$0xff]  }
  0x5a   :  { %v2983_v12 = vld [vmem:[%s4280_s3 + $0x1e8] ss:$16 sps:$4 sm:$0xff]   ;;  %v2991_v14 = vld [vmem:[%s4280_s3 + $0x1cc] ss:$16 sps:$4 sm:$0xff]  }
  0x5b   :  { %v2986_v13 = vld [vmem:[%s4280_s3 + $0x3e8] ss:$16 sps:$4 sm:$0xff]   ;;  %v2994_v17 = vld [vmem:[%s4280_s3 + $0x3cc] ss:$16 sps:$4 sm:$0xff]  }
  0xca   :  { %v144_v24 = vpop.f32.mrf.mxu0  ;;  %v185_v25 = vpop.f32.mrf.mxu1 }
  0xcb   :  { %v145_v26 = vadd.f32 %v144_v24, %v49_v20  ;;  %v186_v27 = vadd.f32 %v185_v25, %v57_v21  ;;  %v2989_v20 = vld [vmem:[%s4280_s3 + $0x1c8] ss:$16 sps:$4 sm:$0xff]  }
  0xcc   :  { %v146_v28 = vpop.f32.mrf.mxu0  ;;  %v187_v29 = vpop.f32.mrf.mxu1  ;;  %v2992_v21 = vld [vmem:[%s4280_s3 + $0x3c8] ss:$16 sps:$4 sm:$0xff]  }
  0xcd   :  { %v194_v30 = vmax.f32 %v186_v27, 0.0  ;;  %v147_v31 = vadd.f32 %v146_v28, %v53_v22  ;;  %v188_v32 = vadd.f32 %v187_v29, %v61_v23  ;;  %v192_v33 = vmax.f32 %v145_v26, 0.0  ;;  %v2997_v22 = vld [vmem:[%s4280_s3 + $0x1ac] ss:$16 sps:$4 sm:$0xff]   ;;  %v2995_v24 = vld [vmem:[%s4280_s3 + $0x1a8] ss:$16 sps:$4 sm:$0xff]  }
  0xce   :  { %v148_v34 = vpop.f32.mrf.mxu0  ;;  %v189_v35 = vpop.f32.mrf.mxu1  ;;  %v3000_v23 = vld [vmem:[%s4280_s3 + $0x3ac] ss:$16 sps:$4 sm:$0xff]   ;;  %v2998_v25 = vld [vmem:[%s4280_s3 + $0x3a8] ss:$16 sps:$4 sm:$0xff]  }
  0xcf   :  { %v193_v36 = vmax.f32 %v147_v31, 0.0  ;;  %v195_v37 = vmax.f32 %v188_v32, 0.0  ;;  %v3569_v38 = vpack.c.bf16 %v194_v30, %v194_v30  ;;  %v3577_v45 = vpack.c.bf16 %v192_v33, %v192_v33  ;;  %v3003_v26 = vld [vmem:[%s4280_s3 + $0x18c] ss:$16 sps:$4 sm:$0xff]   ;;  %v3001_v28 = vld [vmem:[%s4280_s3 + $0x188] ss:$16 sps:$4 sm:$0xff]  }
  0xd0   :  { %v149_v39 = vpop.f32.mrf.mxu0  ;;  %v190_v40 = vpop.f32.mrf.mxu1  ;;  %v3006_v27 = vld [vmem:[%s4280_s3 + $0x38c] ss:$16 sps:$4 sm:$0xff]   ;;  %v3004_v29 = vld [vmem:[%s4280_s3 + $0x388] ss:$16 sps:$4 sm:$0xff]  }
  0xd1   :  { %v197_v41 = vpack.c.bf16 %v193_v36, %v193_v36  ;;  %v199_v42 = vpack.c.bf16 %v195_v37, %v195_v37  ;;  %v3009_v30 = vld [vmem:[%s4280_s3 + $0x16c] ss:$16 sps:$4 sm:$0xff]   ;;  %v3007_v32 = vld [vmem:[%s4280_s3 + $0x168] ss:$16 sps:$4 sm:$0xff]  }
  0xd2   :  { %v3012_v31 = vld [vmem:[%s4280_s3 + $0x36c] ss:$16 sps:$4 sm:$0xff]   ;;  %v3010_v33 = vld [vmem:[%s4280_s3 + $0x368] ss:$16 sps:$4 sm:$0xff]  }
  0xd3   :  { %1022 = vmatprep.mubr.bf16.mxu0 %v197_v41  ;;  %1063 = vmatprep.mubr.bf16.mxu1 %v199_v42  ;;  %v3015_v34 = vld [vmem:[%s4280_s3 + $0x14c] ss:$16 sps:$4 sm:$0xff]   ;;  %v3013_v36 = vld [vmem:[%s4280_s3 + $0x148] ss:$16 sps:$4 sm:$0xff]  }
  0xd4   :  { %1023 = vmatmul.mubr.bf16.vlgmr.msra.gmra.mxu0 %v3577_v45  ;;  %1064 = vmatmul.mubr.bf16.vlgmr.msra.gmra.mxu1 %v3569_v38  ;;  %v3018_v35 = vld [vmem:[%s4280_s3 + $0x34c] ss:$16 sps:$4 sm:$0xff]   ;;  %v3016_v37 = vld [vmem:[%s4280_s3 + $0x348] ss:$16 sps:$4 sm:$0xff]  }
  0xd5   :  { %1073 = vmatpush1.bf16.msra.mxu0 %v2935_v43  ;;  %1114 = vmatpush1.bf16.msra.mxu1 %v2938_v44  ;;  %v3021_v39 = vld [vmem:[%s4280_s3 + $0x12c] ss:$16 sps:$4 sm:$0xff]  }
  0xd6   :  { %1104 = vmatprep.mubr.bf16.mxu0 %v197_v41  ;;  %1145 = vmatprep.mubr.bf16.mxu1 %v199_v42  ;;  %v3024_v40 = vld [vmem:[%s4280_s3 + $0x32c] ss:$16 sps:$4 sm:$0xff]   ;;  %v3019_v41 = vld [vmem:[%s4280_s3 + $0x128] ss:$16 sps:$4 sm:$0xff]  }
  0xd7   :  { %1074 = vmatprep.subr.bf16.mxu0 %v2943_v46  ;;  %1115 = vmatprep.subr.bf16.mxu1 %v2946_v47  ;;  %v3022_v42 = vld [vmem:[%s4280_s3 + $0x328] ss:$16 sps:$4 sm:$0xff]   ;;  %v3027_v43 = vld [vmem:[%s4280_s3 + $0x10c] ss:$16 sps:$4 sm:$0xff]  }
  0xd8   :  { %v3030_v44 = vld [vmem:[%s4280_s3 + $0x30c] ss:$16 sps:$4 sm:$0xff]   ;;  %v3025_v46 = vld [vmem:[%s4280_s3 + $0x108] ss:$16 sps:$4 sm:$0xff]  }
  0xd9   :  { %1075 = vmatpush1.bf16.msra.mxu0 %v2941_v48  ;;  %1116 = vmatpush1.bf16.msra.mxu1 %v2944_v49  ;;  %v3028_v47 = vld [vmem:[%s4280_s3 + $0x308] ss:$16 sps:$4 sm:$0xff]   ;;  %v3033_v48 = vld [vmem:[%s4282_s5 + $0xe4] ss:$16 sps:$4 sm:$0xff]   ;;  %v3031_v49 = vld [vmem:[%s4282_s5 + $0xe0] ss:$16 sps:$4 sm:$0xff]  }
  0xda   :  { %1076 = vmatprep.subr.bf16.mxu0 %v2949_v50  ;;  %1117 = vmatprep.subr.bf16.mxu1 %v2952_v51  ;;  %v3036_v50 = vld [vmem:[%s4282_s5 + $0xc4] ss:$16 sps:$4 sm:$0xff]   ;;  %v3034_v51 = vld [vmem:[%s4282_s5 + $0xc0] ss:$16 sps:$4 sm:$0xff]  }
  0xdd   :  { %1077 = vmatpush1.bf16.msra.mxu0 %v2947_v52  ;;  %1118 = vmatpush1.bf16.msra.mxu1 %v2950_v53  ;;  %v3039_v52 = vld [vmem:[%s4282_s5 + $0xa4] ss:$16 sps:$4 sm:$0xff]   ;;  %v3037_v53 = vld [vmem:[%s4282_s5 + $0xa0] ss:$16 sps:$4 sm:$0xff]  }
  0xde   :  { %1078 = vmatprep.subr.bf16.mxu0 %v2955_v54  ;;  %1119 = vmatprep.subr.bf16.mxu1 %v2958_v55  ;;  %v3079_v54 = vld [vmem:[%s4282_s5 + $0x2e0] ss:$16 sps:$4 sm:$0xff]   ;;  %v3081_v55 = vld [vmem:[%s4282_s5 + $0x2e4] ss:$16 sps:$4 sm:$0xff]  }
  0xe1   :  { %1079 = vmatpush1.bf16.msra.mxu0 %v2953_v56  ;;  %1120 = vmatpush1.bf16.msra.mxu1 %v2956_v57  ;;  %v3045_v56 = vld [vmem:[%s4282_s5 + $0x64] ss:$16 sps:$4 sm:$0xff]   ;;  %v3043_v57 = vld [vmem:[%s4282_s5 + $0x60] ss:$16 sps:$4 sm:$0xff]  }
  0xe2   :  { %1080 = vmatprep.subr.bf16.mxu0 %v2961_v58  ;;  %1121 = vmatprep.subr.bf16.mxu1 %v2964_v59  ;;  %v3085_v58 = vld [vmem:[%s4282_s5 + $0x2c0] ss:$16 sps:$4 sm:$0xff]   ;;  %v3087_v59 = vld [vmem:[%s4282_s5 + $0x2c4] ss:$16 sps:$4 sm:$0xff]  }
  0xe5   :  { %1081 = vmatpush1.bf16.msra.mxu0 %v2959_v60  ;;  %1122 = vmatpush1.bf16.msra.mxu1 %v2962_v61  ;;  %v3048_v60 = vld [vmem:[%s4282_s5 + $0x44] ss:$16 sps:$4 sm:$0xff]   ;;  %v3046_v61 = vld [vmem:[%s4282_s5 + $0x40] ss:$16 sps:$4 sm:$0xff]  }
  0xe6   :  { %1082 = vmatprep.subr.bf16.mxu0 %v2967_v62  ;;  %1123 = vmatprep.subr.bf16.mxu1 %v2970_v63  ;;  %v3091_v62 = vld [vmem:[%s4282_s5 + $0x2a0] ss:$16 sps:$4 sm:$0xff]   ;;  %v3093_v63 = vld [vmem:[%s4282_s5 + $0x2a4] ss:$16 sps:$4 sm:$0xff]  }
  0xe9   :  { %1083 = vmatpush1.bf16.msra.mxu0 %v2965_v0  ;;  %1124 = vmatpush1.bf16.msra.mxu1 %v2968_v1  ;;  %v3051_v0 = vld [vmem:[%s4282_s5 + $0x24] ss:$16 sps:$4 sm:$0xff]   ;;  %v3049_v1 = vld [vmem:[%s4282_s5 + $0x20] ss:$16 sps:$4 sm:$0xff]  }
  0xea   :  { %1084 = vmatprep.subr.bf16.mxu0 %v2973_v2  ;;  %1125 = vmatprep.subr.bf16.mxu1 %v2976_v3  ;;  %v3097_v2 = vld [vmem:[%s4282_s5 + $0x280] ss:$16 sps:$4 sm:$0xff]   ;;  %v3099_v3 = vld [vmem:[%s4282_s5 + $0x284] ss:$16 sps:$4 sm:$0xff]  }
  0xed   :  { %1085 = vmatpush1.bf16.msra.mxu0 %v2971_v4  ;;  %1126 = vmatpush1.bf16.msra.mxu1 %v2974_v5  ;;  %v3054_v4 = vld [vmem:[%s4282_s5 + $0x4] ss:$16 sps:$4 sm:$0xff]   ;;  %v3052_v5 = vld [vmem:[%s4282_s5] ss:$16 sps:$4 sm:$0xff]  }
  0xee   :  { %1086 = vmatprep.subr.bf16.mxu0 %v2979_v6  ;;  %1127 = vmatprep.subr.bf16.mxu1 %v2982_v7  ;;  %v3103_v6 = vld [vmem:[%s4282_s5 + $0x260] ss:$16 sps:$4 sm:$0xff]   ;;  %v3105_v7 = vld [vmem:[%s4282_s5 + $0x264] ss:$16 sps:$4 sm:$0xff]  }
  0xf1   :  { %1087 = vmatpush1.bf16.msra.mxu0 %v2977_v8  ;;  %1128 = vmatpush1.bf16.msra.mxu1 %v2980_v9  ;;  %v3057_v8 = vld [vmem:[%s4282_s5 + $0x1e4] ss:$16 sps:$4 sm:$0xff]   ;;  %v3055_v9 = vld [vmem:[%s4282_s5 + $0x1e0] ss:$16 sps:$4 sm:$0xff]  }
  0xf2   :  { %1088 = vmatprep.subr.bf16.mxu0 %v2985_v10  ;;  %1129 = vmatprep.subr.bf16.mxu1 %v2988_v11  ;;  %v3109_v10 = vld [vmem:[%s4282_s5 + $0x240] ss:$16 sps:$4 sm:$0xff]   ;;  %v3111_v11 = vld [vmem:[%s4282_s5 + $0x244] ss:$16 sps:$4 sm:$0xff]  }
  0xf5   :  { %1089 = vmatpush2.bf16.msra.mxu0 %v2983_v12  ;;  %1130 = vmatpush2.bf16.msra.mxu1 %v2986_v13  ;;  %v3060_v12 = vld [vmem:[%s4282_s5 + $0x1c4] ss:$16 sps:$4 sm:$0xff]   ;;  %v3058_v13 = vld [vmem:[%s4282_s5 + $0x1c0] ss:$16 sps:$4 sm:$0xff]  }
  0xf6   :  { %1090 = vmatprep.subr.bf16.mxu0 %v2991_v14  ;;  %1131 = vmatprep.subr.bf16.mxu1 %v2994_v17  ;;  %v3115_v14 = vld [vmem:[%s4282_s5 + $0x220] ss:$16 sps:$4 sm:$0xff]   ;;  %v3117_v17 = vld [vmem:[%s4282_s5 + $0x224] ss:$16 sps:$4 sm:$0xff]  }
  0xf9   :  { %1091 = vmatpush2.bf16.msra.mxu0 %v2989_v20  ;;  %1132 = vmatpush2.bf16.msra.mxu1 %v2992_v21  ;;  %v3063_v20 = vld [vmem:[%s4282_s5 + $0x1a4] ss:$16 sps:$4 sm:$0xff]   ;;  %v3061_v21 = vld [vmem:[%s4282_s5 + $0x1a0] ss:$16 sps:$4 sm:$0xff]  }
  0xfa   :  { %1092 = vmatprep.subr.bf16.mxu0 %v2997_v22  ;;  %1133 = vmatprep.subr.bf16.mxu1 %v3000_v23  ;;  %v3121_v22 = vld [vmem:[%s4282_s5 + $0x200] ss:$16 sps:$4 sm:$0xff]   ;;  %v3123_v23 = vld [vmem:[%s4282_s5 + $0x204] ss:$16 sps:$4 sm:$0xff]  }
  0xfd   :  { %1093 = vmatpush2.bf16.msra.mxu0 %v2995_v24  ;;  %1134 = vmatpush2.bf16.msra.mxu1 %v2998_v25  ;;  %v3066_v24 = vld [vmem:[%s4282_s5 + $0x184] ss:$16 sps:$4 sm:$0xff]   ;;  %v3064_v25 = vld [vmem:[%s4282_s5 + $0x180] ss:$16 sps:$4 sm:$0xff]  }
  0xfe   :  { %1094 = vmatprep.subr.bf16.mxu0 %v3003_v26  ;;  %1135 = vmatprep.subr.bf16.mxu1 %v3006_v27  ;;  %v3127_v26 = vld [vmem:[%s4282_s5 + $0x3e0] ss:$16 sps:$4 sm:$0xff]   ;;  %v3129_v27 = vld [vmem:[%s4282_s5 + $0x3e4] ss:$16 sps:$4 sm:$0xff]  }
 0x101   :  { %1095 = vmatpush2.bf16.msra.mxu0 %v3001_v28  ;;  %1136 = vmatpush2.bf16.msra.mxu1 %v3004_v29  ;;  %v3069_v28 = vld [vmem:[%s4282_s5 + $0x164] ss:$16 sps:$4 sm:$0xff]   ;;  %v3067_v29 = vld [vmem:[%s4282_s5 + $0x160] ss:$16 sps:$4 sm:$0xff]  }
 0x102   :  { %1096 = vmatprep.subr.bf16.mxu0 %v3009_v30  ;;  %1137 = vmatprep.subr.bf16.mxu1 %v3012_v31  ;;  %v3133_v30 = vld [vmem:[%s4282_s5 + $0x3c0] ss:$16 sps:$4 sm:$0xff]   ;;  %v3135_v31 = vld [vmem:[%s4282_s5 + $0x3c4] ss:$16 sps:$4 sm:$0xff]  }
 0x105   :  { %1097 = vmatpush2.bf16.msra.mxu0 %v3007_v32  ;;  %1138 = vmatpush2.bf16.msra.mxu1 %v3010_v33  ;;  %v3072_v32 = vld [vmem:[%s4282_s5 + $0x144] ss:$16 sps:$4 sm:$0xff]   ;;  %v3070_v33 = vld [vmem:[%s4282_s5 + $0x140] ss:$16 sps:$4 sm:$0xff]  }
 0x106   :  { %1098 = vmatprep.subr.bf16.mxu0 %v3015_v34  ;;  %1139 = vmatprep.subr.bf16.mxu1 %v3018_v35  ;;  %v3139_v34 = vld [vmem:[%s4282_s5 + $0x3a0] ss:$16 sps:$4 sm:$0xff]   ;;  %v3141_v35 = vld [vmem:[%s4282_s5 + $0x3a4] ss:$16 sps:$4 sm:$0xff]  }
 0x109   :  { %1099 = vmatpush2.bf16.msra.mxu0 %v3013_v36  ;;  %1140 = vmatpush2.bf16.msra.mxu1 %v3016_v37  ;;  %v3075_v36 = vld [vmem:[%s4282_s5 + $0x124] ss:$16 sps:$4 sm:$0xff]   ;;  %v3073_v37 = vld [vmem:[%s4282_s5 + $0x120] ss:$16 sps:$4 sm:$0xff]  }
 0x10a   :  { %1100 = vmatprep.subr.bf16.mxu0 %v3021_v39  ;;  %1141 = vmatprep.subr.bf16.mxu1 %v3024_v40  ;;  %v3145_v39 = vld [vmem:[%s4282_s5 + $0x380] ss:$16 sps:$4 sm:$0xff]   ;;  %v3147_v40 = vld [vmem:[%s4282_s5 + $0x384] ss:$16 sps:$4 sm:$0xff]  }
 0x10d   :  { %1101 = vmatpush2.bf16.msra.mxu0 %v3019_v41  ;;  %1142 = vmatpush2.bf16.msra.mxu1 %v3022_v42  ;;  %v3078_v41 = vld [vmem:[%s4282_s5 + $0x104] ss:$16 sps:$4 sm:$0xff]   ;;  %v3076_v42 = vld [vmem:[%s4282_s5 + $0x100] ss:$16 sps:$4 sm:$0xff]  }
 0x10e   :  { %1102 = vmatprep.subr.bf16.mxu0 %v3027_v43  ;;  %1143 = vmatprep.subr.bf16.mxu1 %v3030_v44  ;;  %v3151_v43 = vld [vmem:[%s4282_s5 + $0x360] ss:$16 sps:$4 sm:$0xff]   ;;  %v3153_v44 = vld [vmem:[%s4282_s5 + $0x364] ss:$16 sps:$4 sm:$0xff]  }
 0x111   :  { %1103 = vmatpush2.bf16.msra.mxu0 %v3025_v46  ;;  %1144 = vmatpush2.bf16.msra.mxu1 %v3028_v47  ;;  %v3084_v46 = vld [vmem:[%s4282_s5 + $0xec] ss:$16 sps:$4 sm:$0xff]   ;;  %v3157_v47 = vld [vmem:[%s4282_s5 + $0x340] ss:$16 sps:$4 sm:$0xff]  }
 0x112   :  { %1952 = vmatprep.subr.bf16.mxu0 %v3033_v48  ;;  %1993 = vmatprep.subr.bf16.mxu1 %v3081_v55  ;;  %v3159_v48 = vld [vmem:[%s4282_s5 + $0x344] ss:$16 sps:$4 sm:$0xff]  }
 0x114   :  { %1105 = vmatmul.mubr.bf16.vlgmr.msra.gmra.mxu0 %v3577_v45  ;;  %1146 = vmatmul.mubr.bf16.vlgmr.msra.gmra.mxu1 %v3569_v38  ;;  %v3042_v38 = vld [vmem:[%s4282_s5 + $0x84] ss:$16 sps:$4 sm:$0xff]   ;;  %v3040_v45 = vld [vmem:[%s4282_s5 + $0x80] ss:$16 sps:$4 sm:$0xff]  }
 0x115   :  { %1953 = vmatpush1.bf16.msra.mxu0 %v3031_v49  ;;  %1994 = vmatpush1.bf16.msra.mxu1 %v3079_v54  ;;  %v3165_v49 = vld [vmem:[%s4282_s5 + $0x324] ss:$16 sps:$4 sm:$0xff]  }
 0x116   :  { %1954 = vmatprep.subr.bf16.mxu0 %v3036_v50  ;;  %1995 = vmatprep.subr.bf16.mxu1 %v3087_v59  ;;  %v3163_v50 = vld [vmem:[%s4282_s5 + $0x320] ss:$16 sps:$4 sm:$0xff]  }
 0x119   :  { %1955 = vmatpush1.bf16.msra.mxu0 %v3034_v51  ;;  %1996 = vmatpush1.bf16.msra.mxu1 %v3085_v58  ;;  %v3171_v51 = vld [vmem:[%s4282_s5 + $0x304] ss:$16 sps:$4 sm:$0xff]  }
 0x11a   :  { %1956 = vmatprep.subr.bf16.mxu0 %v3039_v52  ;;  %1997 = vmatprep.subr.bf16.mxu1 %v3093_v63  ;;  %v3169_v52 = vld [vmem:[%s4282_s5 + $0x300] ss:$16 sps:$4 sm:$0xff]  }
 0x11d   :  { %1957 = vmatpush1.bf16.msra.mxu0 %v3037_v53  ;;  %1998 = vmatpush1.bf16.msra.mxu1 %v3091_v62  ;;  %v3177_v53 = vld [vmem:[%s4282_s5 + $0x2ec] ss:$16 sps:$4 sm:$0xff]  }
 0x11e   :  { %1958 = vmatprep.subr.bf16.mxu0 %v3042_v38  ;;  %1999 = vmatprep.subr.bf16.mxu1 %v3099_v3  ;;  %v3964_v38 = vld [vmem:[%s4281_s4] sm:$0xf] }
 0x11f   :  { %v337_v54 = vrot.slane %v3964_v38, %v3561_v18 }
 0x121   :  { %1959 = vmatpush1.bf16.msra.mxu0 %v3040_v45  ;;  %2000 = vmatpush1.bf16.msra.mxu1 %v3097_v2  ;;  %v333_v45 = vrot.slane %v3964_v38, %v3554_v15 }
 0x122   :  { %1960 = vmatprep.subr.bf16.mxu0 %v3045_v56  ;;  %2001 = vmatprep.subr.bf16.mxu1 %v3105_v7 }
 0x125   :  { %1961 = vmatpush1.bf16.msra.mxu0 %v3043_v57  ;;  %2002 = vmatpush1.bf16.msra.mxu1 %v3103_v6  ;;  %v3082_v6 = vld [vmem:[%s4282_s5 + $0xe8] ss:$16 sps:$4 sm:$0xff]  }
 0x126   :  { %1962 = vmatprep.subr.bf16.mxu0 %v3048_v60  ;;  %2003 = vmatprep.subr.bf16.mxu1 %v3111_v11  ;;  %v3094_v11 = vld [vmem:[%s4282_s5 + $0xa8] ss:$16 sps:$4 sm:$0xff]  }
 0x129   :  { %1963 = vmatpush1.bf16.msra.mxu0 %v3046_v61  ;;  %2004 = vmatpush1.bf16.msra.mxu1 %v3109_v10  ;;  %v3096_v10 = vld [vmem:[%s4282_s5 + $0xac] ss:$16 sps:$4 sm:$0xff]  }
 0x12a   :  { %1964 = vmatprep.subr.bf16.mxu0 %v3051_v0  ;;  %2005 = vmatprep.subr.bf16.mxu1 %v3117_v17  ;;  %v3106_v17 = vld [vmem:[%s4282_s5 + $0x68] ss:$16 sps:$4 sm:$0xff]  }
 0x12d   :  { %1965 = vmatpush1.bf16.msra.mxu0 %v3049_v1  ;;  %2006 = vmatpush1.bf16.msra.mxu1 %v3115_v14  ;;  %v3108_v14 = vld [vmem:[%s4282_s5 + $0x6c] ss:$16 sps:$4 sm:$0xff]  }
 0x12e   :  { %1966 = vmatprep.subr.bf16.mxu0 %v3054_v4  ;;  %2007 = vmatprep.subr.bf16.mxu1 %v3123_v23  ;;  %v3118_v23 = vld [vmem:[%s4282_s5 + $0x28] ss:$16 sps:$4 sm:$0xff]  }
 0x131   :  { %1967 = vmatpush1.bf16.msra.mxu0 %v3052_v5  ;;  %2008 = vmatpush1.bf16.msra.mxu1 %v3121_v22  ;;  %v3120_v22 = vld [vmem:[%s4282_s5 + $0x2c] ss:$16 sps:$4 sm:$0xff]  }
 0x132   :  { %1968 = vmatprep.subr.bf16.mxu0 %v3057_v8  ;;  %2009 = vmatprep.subr.bf16.mxu1 %v3129_v27  ;;  %v3090_v8 = vld [vmem:[%s4282_s5 + $0xcc] ss:$16 sps:$4 sm:$0xff]   ;;  %v3130_v27 = vld [vmem:[%s4282_s5 + $0x1e8] ss:$16 sps:$4 sm:$0xff]  }
 0x135   :  { %1969 = vmatpush2.bf16.msra.mxu0 %v3055_v9  ;;  %2010 = vmatpush2.bf16.msra.mxu1 %v3127_v26  ;;  %v3088_v9 = vld [vmem:[%s4282_s5 + $0xc8] ss:$16 sps:$4 sm:$0xff]   ;;  %v3132_v26 = vld [vmem:[%s4282_s5 + $0x1ec] ss:$16 sps:$4 sm:$0xff]  }
 0x136   :  { %1970 = vmatprep.subr.bf16.mxu0 %v3060_v12  ;;  %2011 = vmatprep.subr.bf16.mxu1 %v3135_v31  ;;  %v3102_v12 = vld [vmem:[%s4282_s5 + $0x8c] ss:$16 sps:$4 sm:$0xff]   ;;  %v3142_v31 = vld [vmem:[%s4282_s5 + $0x1a8] ss:$16 sps:$4 sm:$0xff]  }
 0x139   :  { %1971 = vmatpush2.bf16.msra.mxu0 %v3058_v13  ;;  %2012 = vmatpush2.bf16.msra.mxu1 %v3133_v30  ;;  %v3100_v13 = vld [vmem:[%s4282_s5 + $0x88] ss:$16 sps:$4 sm:$0xff]   ;;  %v3144_v30 = vld [vmem:[%s4282_s5 + $0x1ac] ss:$16 sps:$4 sm:$0xff]  }
 0x13a   :  { %1972 = vmatprep.subr.bf16.mxu0 %v3063_v20  ;;  %2013 = vmatprep.subr.bf16.mxu1 %v3141_v35  ;;  %v3114_v20 = vld [vmem:[%s4282_s5 + $0x4c] ss:$16 sps:$4 sm:$0xff]   ;;  %v3154_v35 = vld [vmem:[%s4282_s5 + $0x168] ss:$16 sps:$4 sm:$0xff]  }
 0x13d   :  { %1973 = vmatpush2.bf16.msra.mxu0 %v3061_v21  ;;  %2014 = vmatpush2.bf16.msra.mxu1 %v3139_v34  ;;  %v3112_v21 = vld [vmem:[%s4282_s5 + $0x48] ss:$16 sps:$4 sm:$0xff]   ;;  %v3156_v34 = vld [vmem:[%s4282_s5 + $0x16c] ss:$16 sps:$4 sm:$0xff]  }
 0x13e   :  { %1974 = vmatprep.subr.bf16.mxu0 %v3066_v24  ;;  %2015 = vmatprep.subr.bf16.mxu1 %v3147_v40  ;;  %v3126_v24 = vld [vmem:[%s4282_s5 + $0xc] ss:$16 sps:$4 sm:$0xff]  }
 0x13f   :  { %v3168_v40 = vld [vmem:[%s4282_s5 + $0x12c] ss:$16 sps:$4 sm:$0xff]  }
 0x141   :  { %1975 = vmatpush2.bf16.msra.mxu0 %v3064_v25  ;;  %2016 = vmatpush2.bf16.msra.mxu1 %v3145_v39  ;;  %v3124_v25 = vld [vmem:[%s4282_s5 + $0x8] ss:$16 sps:$4 sm:$0xff]  }
 0x142   :  { %1976 = vmatprep.subr.bf16.mxu0 %v3069_v28  ;;  %2017 = vmatprep.subr.bf16.mxu1 %v3153_v44  ;;  %v3138_v28 = vld [vmem:[%s4282_s5 + $0x1cc] ss:$16 sps:$4 sm:$0xff]   ;;  %v3160_v39 = vld [vmem:[%s4282_s5 + $0x148] ss:$16 sps:$4 sm:$0xff]  }
 0x145   :  { %1977 = vmatpush2.bf16.msra.mxu0 %v3067_v29  ;;  %2018 = vmatpush2.bf16.msra.mxu1 %v3151_v43  ;;  %v3136_v29 = vld [vmem:[%s4282_s5 + $0x1c8] ss:$16 sps:$4 sm:$0xff]  }
 0x146   :  { %1978 = vmatprep.subr.bf16.mxu0 %v3072_v32  ;;  %2019 = vmatprep.subr.bf16.mxu1 %v3159_v48  ;;  %v3150_v32 = vld [vmem:[%s4282_s5 + $0x18c] ss:$16 sps:$4 sm:$0xff]  }
 0x149   :  { %1979 = vmatpush2.bf16.msra.mxu0 %v3070_v33  ;;  %2020 = vmatpush2.bf16.msra.mxu1 %v3157_v47  ;;  %v3148_v33 = vld [vmem:[%s4282_s5 + $0x188] ss:$16 sps:$4 sm:$0xff]  }
 0x14a   :  { %1980 = vmatprep.subr.bf16.mxu0 %v3075_v36  ;;  %2021 = vmatprep.subr.bf16.mxu1 %v3165_v49  ;;  %v3162_v36 = vld [vmem:[%s4282_s5 + $0x14c] ss:$16 sps:$4 sm:$0xff]  }
 0x14b   :  { %v3174_v49 = vld [vmem:[%s4282_s5 + $0x10c] ss:$16 sps:$4 sm:$0xff]  }
 0x14d   :  { %1981 = vmatpush2.bf16.msra.mxu0 %v3073_v37  ;;  %2022 = vmatpush2.bf16.msra.mxu1 %v3163_v50  ;;  %v341_v37 = vrot.slane %v3964_v38, %v3556_v16 }
 0x14e   :  { %1982 = vmatprep.subr.bf16.mxu0 %v3078_v41  ;;  %2023 = vmatprep.subr.bf16.mxu1 %v3171_v51  ;;  %v345_v41 = vrot.slane %v3964_v38, %v3563_v19 }
 0x151   :  { %1983 = vmatpush2.bf16.msra.mxu0 %v3076_v42  ;;  %2024 = vmatpush2.bf16.msra.mxu1 %v3169_v52 }
 0x152   :  { %2034 = vmatprep.subr.bf16.mxu0 %v3084_v46  ;;  %2075 = vmatprep.subr.bf16.mxu1 %v3177_v53  ;;  %v3166_v46 = vld [vmem:[%s4282_s5 + $0x128] ss:$16 sps:$4 sm:$0xff]  }
 0x194   :  { %v1024_v55 = vpop.f32.mrf.mxu0  ;;  %v1065_v56 = vpop.f32.mrf.mxu1 }
 0x195   :  { %v1025_v57 = vadd.f32 %v1024_v55, %v333_v45  ;;  %v3172_v45 = vld [vmem:[%s4282_s5 + $0x108] ss:$16 sps:$4 sm:$0xff]  }
 0x196   :  { %v1026_v58 = vpop.f32.mrf.mxu0  ;;  %v1067_v59 = vpop.f32.mrf.mxu1 }
 0x197   :  { %v1066_v60 = vadd.f32 %v1065_v56, %v1025_v57  ;;  %v1027_v61 = vadd.f32 %v1026_v58, %v337_v54 }
 0x198   :  { %v1028_v62 = vpop.f32.mrf.mxu0  ;;  %v1069_v63 = vpop.f32.mrf.mxu1 }
 0x199   :  { %v1068_v0 = vadd.f32 %v1067_v59, %v1027_v61  ;;  %v1154_v1 = vmax.f32 %v1066_v60, 0.0  ;;  %v3175_v59 = vld [vmem:[%s4282_s5 + $0x2e8] ss:$16 sps:$4 sm:$0xff]   ;;  %v3180_v61 = vld [vmem:[%s4282_s5 + $0x2cc] ss:$16 sps:$4 sm:$0xff]  }
 0x19a   :  { %v1029_v2 = vpop.f32.mrf.mxu0  ;;  %v1070_v3 = vpop.f32.mrf.mxu1  ;;  %v3178_v62 = vld [vmem:[%s4282_s5 + $0x2c8] ss:$16 sps:$4 sm:$0xff]   ;;  %v3183_v63 = vld [vmem:[%s4282_s5 + $0x2ac] ss:$16 sps:$4 sm:$0xff]  }
 0x19b   :  { %v1155_v4 = vmax.f32 %v1068_v0, 0.0  ;;  %v3973_v7 = vpack.c.bf16 %v1154_v1, %v1154_v1  ;;  %v3181_v0 = vld [vmem:[%s4282_s5 + $0x2a8] ss:$16 sps:$4 sm:$0xff]   ;;  %v3186_v1 = vld [vmem:[%s4282_s5 + $0x28c] ss:$16 sps:$4 sm:$0xff]  }
 0x19c   :  { %v3223_v2 = vld [vmem:[%s4284_s7 + $0x78] sm:$0xff]  }
 0x19d   :  { %v1159_v5 = vpack.c.bf16 %v1155_v4, %v1155_v4  ;;  %v3224_v3 = vld [vmem:[%s4284_s7 + $0x38] sm:$0xff]   ;;  %v3225_v4 = vld [vmem:[%s4284_s7 + $0x70] sm:$0xff]  }
 0x19f   :  { %1984 = vmatprep.mubr.bf16.mxu0 %v1159_v5 }
 0x1a0   :  { %1985 = vmatmul.mubr.bf16.vlgmr.msra.gmra.mxu0 %v3973_v7 }
 0x1a1   :  { %2035 = vmatpush1.bf16.msra.mxu0 %v3082_v6  ;;  %2066 = vmatprep.mubr.bf16.mxu0 %v1159_v5  ;;  %v3184_v5 = vld [vmem:[%s4282_s5 + $0x288] ss:$16 sps:$4 sm:$0xff]   ;;  %v3226_v6 = vld [vmem:[%s4284_s7 + $0x30] sm:$0xff]  }
 0x1a2   :  { %2036 = vmatprep.subr.bf16.mxu0 %v3090_v8  ;;  %v3227_v8 = vld [vmem:[%s4284_s7 + $0x68] sm:$0xff]  }
 0x1a5   :  { %2037 = vmatpush1.bf16.msra.mxu0 %v3088_v9  ;;  %v3187_v9 = vld [vmem:[%s4282_s5 + $0x268] ss:$16 sps:$4 sm:$0xff]  }
 0x1a6   :  { %2038 = vmatprep.subr.bf16.mxu0 %v3096_v10  ;;  %v3228_v10 = vld [vmem:[%s4284_s7 + $0x28] sm:$0xff]  }
 0x1a9   :  { %2039 = vmatpush1.bf16.msra.mxu0 %v3094_v11  ;;  %v3192_v11 = vld [vmem:[%s4282_s5 + $0x24c] ss:$16 sps:$4 sm:$0xff]  }
 0x1aa   :  { %2040 = vmatprep.subr.bf16.mxu0 %v3102_v12  ;;  %v3229_v12 = vld [vmem:[%s4284_s7 + $0x60] sm:$0xff]  }
 0x1ad   :  { %2041 = vmatpush1.bf16.msra.mxu0 %v3100_v13  ;;  %v3190_v13 = vld [vmem:[%s4282_s5 + $0x248] ss:$16 sps:$4 sm:$0xff]  }
 0x1ae   :  { %2042 = vmatprep.subr.bf16.mxu0 %v3108_v14  ;;  %v3230_v14 = vld [vmem:[%s4284_s7 + $0x20] sm:$0xff]  }
 0x1b1   :  { %2043 = vmatpush1.bf16.msra.mxu0 %v3106_v17  ;;  %v3195_v17 = vld [vmem:[%s4282_s5 + $0x22c] ss:$16 sps:$4 sm:$0xff]  }
 0x1b2   :  { %2044 = vmatprep.subr.bf16.mxu0 %v3114_v20  ;;  %v3231_v20 = vld [vmem:[%s4284_s7 + $0x58] sm:$0xff]  }
 0x1b5   :  { %2045 = vmatpush1.bf16.msra.mxu0 %v3112_v21  ;;  %v3193_v21 = vld [vmem:[%s4282_s5 + $0x228] ss:$16 sps:$4 sm:$0xff]  }
 0x1b6   :  { %2046 = vmatprep.subr.bf16.mxu0 %v3120_v22  ;;  %v3232_v22 = vld [vmem:[%s4284_s7 + $0x18] sm:$0xff]  }
 0x1b9   :  { %2047 = vmatpush1.bf16.msra.mxu0 %v3118_v23  ;;  %v3198_v23 = vld [vmem:[%s4282_s5 + $0x20c] ss:$16 sps:$4 sm:$0xff]  }
 0x1ba   :  { %2048 = vmatprep.subr.bf16.mxu0 %v3126_v24  ;;  %v3233_v24 = vld [vmem:[%s4284_s7 + $0x50] sm:$0xff]  }
 0x1bd   :  { %2049 = vmatpush1.bf16.msra.mxu0 %v3124_v25  ;;  %v3196_v25 = vld [vmem:[%s4282_s5 + $0x208] ss:$16 sps:$4 sm:$0xff]  }
 0x1be   :  { %2050 = vmatprep.subr.bf16.mxu0 %v3132_v26  ;;  %v3234_v26 = vld [vmem:[%s4284_s7 + $0x10] sm:$0xff]  }
 0x1c1   :  { %2051 = vmatpush2.bf16.msra.mxu0 %v3130_v27  ;;  %v3201_v27 = vld [vmem:[%s4282_s5 + $0x3ec] ss:$16 sps:$4 sm:$0xff]  }
 0x1c2   :  { %2052 = vmatprep.subr.bf16.mxu0 %v3138_v28  ;;  %v3199_v28 = vld [vmem:[%s4282_s5 + $0x3e8] ss:$16 sps:$4 sm:$0xff]  }
 0x1c5   :  { %2053 = vmatpush2.bf16.msra.mxu0 %v3136_v29  ;;  %v3204_v29 = vld [vmem:[%s4282_s5 + $0x3cc] ss:$16 sps:$4 sm:$0xff]  }
 0x1c6   :  { %2054 = vmatprep.subr.bf16.mxu0 %v3144_v30  ;;  %v3202_v30 = vld [vmem:[%s4282_s5 + $0x3c8] ss:$16 sps:$4 sm:$0xff]  }
 0x1c9   :  { %2055 = vmatpush2.bf16.msra.mxu0 %v3142_v31  ;;  %v3207_v31 = vld [vmem:[%s4282_s5 + $0x3ac] ss:$16 sps:$4 sm:$0xff]  }
 0x1ca   :  { %2056 = vmatprep.subr.bf16.mxu0 %v3150_v32  ;;  %v3205_v32 = vld [vmem:[%s4282_s5 + $0x3a8] ss:$16 sps:$4 sm:$0xff]  }
 0x1cd   :  { %2057 = vmatpush2.bf16.msra.mxu0 %v3148_v33  ;;  %v3210_v33 = vld [vmem:[%s4282_s5 + $0x38c] ss:$16 sps:$4 sm:$0xff]  }
 0x1ce   :  { %2058 = vmatprep.subr.bf16.mxu0 %v3156_v34  ;;  %v3208_v34 = vld [vmem:[%s4282_s5 + $0x388] ss:$16 sps:$4 sm:$0xff]  }
 0x1d1   :  { %2059 = vmatpush2.bf16.msra.mxu0 %v3154_v35  ;;  %v3213_v35 = vld [vmem:[%s4282_s5 + $0x36c] ss:$16 sps:$4 sm:$0xff]  }
 0x1d2   :  { %2060 = vmatprep.subr.bf16.mxu0 %v3162_v36  ;;  %v3211_v36 = vld [vmem:[%s4282_s5 + $0x368] ss:$16 sps:$4 sm:$0xff]  }
 0x1d4   :  { %v1106_v42 = vpop.f32.mrf.mxu0  ;;  %v1147_v43 = vpop.f32.mrf.mxu1 }
 0x1d5   :  { %v1107_v44 = vadd.f32 %v1106_v42, %v341_v37  ;;  %2061 = vmatpush2.bf16.msra.mxu0 %v3160_v39  ;;  %v3216_v37 = vld [vmem:[%s4282_s5 + $0x34c] ss:$16 sps:$4 sm:$0xff]   ;;  %v3214_v39 = vld [vmem:[%s4282_s5 + $0x348] ss:$16 sps:$4 sm:$0xff]  }
 0x1d6   :  { %v1108_v47 = vpop.f32.mrf.mxu0  ;;  %v1149_v48 = vpop.f32.mrf.mxu1  ;;  %2062 = vmatprep.subr.bf16.mxu0 %v3168_v40  ;;  %v3219_v40 = vld [vmem:[%s4282_s5 + $0x32c] ss:$16 sps:$4 sm:$0xff]  }
 0x1d7   :  { %v1148_v50 = vadd.f32 %v1147_v43, %v1107_v44  ;;  %v1109_v51 = vadd.f32 %v1108_v47, %v345_v41  ;;  %v3217_v41 = vld [vmem:[%s4282_s5 + $0x328] ss:$16 sps:$4 sm:$0xff]   ;;  %v3222_v42 = vld [vmem:[%s4282_s5 + $0x30c] ss:$16 sps:$4 sm:$0xff]   ;;  %v3237_v47 = vld [vmem:[%s4284_s7 + $0x40] sm:$0xff]  }
 0x1d8   :  { %v1110_v52 = vpop.f32.mrf.mxu0  ;;  %v1151_v53 = vpop.f32.mrf.mxu1  ;;  %v3220_v43 = vld [vmem:[%s4282_s5 + $0x308] ss:$16 sps:$4 sm:$0xff]  }
 0x1d9   :  { %v1150_v38 = vadd.f32 %v1149_v48, %v1109_v51  ;;  %2063 = vmatpush2.bf16.msra.mxu0 %v3166_v46  ;;  %v1156_v54 = vmax.f32 %v1148_v50, 0.0  ;;  %v3235_v44 = vld [vmem:[%s4284_s7 + $0x48] sm:$0xff]   ;;  %v3238_v48 = vld [vmem:[%s4284_s7] sm:$0xff]   ;;  %v3240_v50 = vld [vmem:[%s4284_s7 + $0xb8] sm:$0xff]  }
 0x1da   :  { %v1111_v55 = vpop.f32.mrf.mxu0  ;;  %v1152_v56 = vpop.f32.mrf.mxu1  ;;  %2064 = vmatprep.subr.bf16.mxu0 %v3174_v49  ;;  %v3236_v46 = vld [vmem:[%s4284_s7 + $0x8] sm:$0xff]   ;;  %v3239_v49 = vld [vmem:[%s4284_s7 + $0xf8] sm:$0xff]   ;;  %v3241_v51 = vld [vmem:[%s4284_s7 + $0xf0] sm:$0xff]  }
 0x1db   :  { %v1157_v57 = vmax.f32 %v1150_v38, 0.0  ;;  %v4073_v60 = vpack.c.bf16 %v1156_v54, %v1156_v54  ;;  %v3242_v52 = vld [vmem:[%s4284_s7 + $0xb0] sm:$0xff]   ;;  %v3243_v53 = vld [vmem:[%s4284_s7 + $0xe8] sm:$0xff]   ;;  %v3246_v54 = vld [vmem:[%s4284_s7 + $0xa0] sm:$0xff]  }
 0x1dc   :  { %v3244_v38 = vld [vmem:[%s4284_s7 + $0xa8] sm:$0xff]   ;;  %v3247_v55 = vld [vmem:[%s4284_s7 + $0xd8] sm:$0xff]  }
 0x1dd   :  { %v1161_v58 = vpack.c.bf16 %v1157_v57, %v1157_v57  ;;  %2065 = vmatpush2.bf16.msra.mxu0 %v3172_v45  ;;  %v3245_v45 = vld [vmem:[%s4284_s7 + $0xe0] sm:$0xff]   ;;  %v3248_v56 = vld [vmem:[%s4284_s7 + $0x98] sm:$0xff]   ;;  %v3249_v57 = vld [vmem:[%s4284_s7 + $0xd0] sm:$0xff]  }
 0x1de   :  { %2781 = vmatprep.subr.bf16.mxu0 %v3223_v2 }
 0x1df   :  { %2025 = vmatprep.mubr.bf16.mxu1 %v1161_v58 }
 0x1e0   :  { %2026 = vmatmul.mubr.bf16.vlgmr.msra.gmra.mxu1 %v4073_v60  ;;  %2067 = vmatmul.mubr.bf16.vlgmr.msra.gmra.mxu0 %v3973_v7  ;;  %v3189_v7 = vld [vmem:[%s4282_s5 + $0x26c] ss:$16 sps:$4 sm:$0xff]  }
 0x1e1   :  { %2076 = vmatpush1.bf16.msra.mxu1 %v3175_v59  ;;  %2107 = vmatprep.mubr.bf16.mxu1 %v1161_v58  ;;  %v3250_v58 = vld [vmem:[%s4284_s7 + $0x90] sm:$0xff]  }
 0x1e2   :  { %2077 = vmatprep.subr.bf16.mxu1 %v3180_v61  ;;  %2782 = vmatpush3.bf16.msra.mxu0 %v3224_v3  ;;  %v3252_v61 = vld [vmem:[%s4284_s7 + $0x88] sm:$0xff]   ;;  %v1290_v3 = vld [vmem:[%s4283_s6] sm:$0xf] }
 0x1e3   :  { %2783 = vmatprep.subr.bf16.mxu0 %v3225_v4  ;;  %v1295_v4 = vrot.slane %v1290_v3, %v3554_v15  ;;  %v1303_v15 = vrot.slane %v1290_v3, %v3556_v16 }
 0x1e5   :  { %2078 = vmatpush1.bf16.msra.mxu1 %v3178_v62 }
 0x1e6   :  { %2079 = vmatprep.subr.bf16.mxu1 %v3183_v63  ;;  %2784 = vmatpush3.bf16.msra.mxu0 %v3226_v6 }
 0x1e7   :  { %2785 = vmatprep.subr.bf16.mxu0 %v3227_v8 }
 0x1e9   :  { %2080 = vmatpush1.bf16.msra.mxu1 %v3181_v0  ;;  %v3253_v0 = vld [vmem:[%s4284_s7 + $0xc0] sm:$0xff]  }
 0x1ea   :  { %2081 = vmatprep.subr.bf16.mxu1 %v3186_v1  ;;  %2786 = vmatpush3.bf16.msra.mxu0 %v3228_v10  ;;  %v3254_v1 = vld [vmem:[%s4284_s7 + $0x80] sm:$0xff]  }
 0x1eb   :  { %2787 = vmatprep.subr.bf16.mxu0 %v3229_v12 }
 0x1ed   :  { %2082 = vmatpush1.bf16.msra.mxu1 %v3184_v5  ;;  %v1299_v5 = vrot.slane %v1290_v3, %v3561_v18  ;;  %v1307_v18 = vrot.slane %v1290_v3, %v3563_v19  ;;  %v2748_v19 = vld [vmem:[%s4285_s8] ss:$0 sm:$0xff] }
 0x1ee   :  { %2083 = vmatprep.subr.bf16.mxu1 %v3189_v7  ;;  %2788 = vmatpush3.bf16.msra.mxu0 %v3230_v14 }
 0x1ef   :  { %2789 = vmatprep.subr.bf16.mxu0 %v3231_v20 }
 0x1f1   :  { %2084 = vmatpush1.bf16.msra.mxu1 %v3187_v9 }
 0x1f2   :  { %2085 = vmatprep.subr.bf16.mxu1 %v3192_v11  ;;  %2790 = vmatpush3.bf16.msra.mxu0 %v3232_v22 }
 0x1f3   :  { %2791 = vmatprep.subr.bf16.mxu0 %v3233_v24 }
 0x1f5   :  { %2086 = vmatpush1.bf16.msra.mxu1 %v3190_v13 }
 0x1f6   :  { %2087 = vmatprep.subr.bf16.mxu1 %v3195_v17  ;;  %2792 = vmatpush3.bf16.msra.mxu0 %v3234_v26 }
 0x1f7   :  { %2793 = vmatprep.subr.bf16.mxu0 %v3235_v44 }
 0x1f9   :  { %2088 = vmatpush1.bf16.msra.mxu1 %v3193_v21 }
 0x1fa   :  { %2089 = vmatprep.subr.bf16.mxu1 %v3198_v23  ;;  %2794 = vmatpush3.bf16.msra.mxu0 %v3236_v46 }
 0x1fb   :  { %2795 = vmatprep.subr.bf16.mxu0 %v3237_v47 }
 0x1fd   :  { %2090 = vmatpush1.bf16.msra.mxu1 %v3196_v25 }
 0x1fe   :  { %2091 = vmatprep.subr.bf16.mxu1 %v3201_v27  ;;  %2796 = vmatpush3.bf16.msra.mxu0 %v3238_v48 }
 0x201   :  { %2092 = vmatpush2.bf16.msra.mxu1 %v3199_v28 }
 0x202   :  { %2093 = vmatprep.subr.bf16.mxu1 %v3204_v29 }
 0x205   :  { %2094 = vmatpush2.bf16.msra.mxu1 %v3202_v30 }
 0x206   :  { %2095 = vmatprep.subr.bf16.mxu1 %v3207_v31 }
 0x209   :  { %2096 = vmatpush2.bf16.msra.mxu1 %v3205_v32 }
 0x20a   :  { %2097 = vmatprep.subr.bf16.mxu1 %v3210_v33 }
 0x20d   :  { %2098 = vmatpush2.bf16.msra.mxu1 %v3208_v34 }
 0x20e   :  { %2099 = vmatprep.subr.bf16.mxu1 %v3213_v35 }
 0x211   :  { %2100 = vmatpush2.bf16.msra.mxu1 %v3211_v36 }
 0x212   :  { %2101 = vmatprep.subr.bf16.mxu1 %v3216_v37 }
 0x215   :  { %2102 = vmatpush2.bf16.msra.mxu1 %v3214_v39 }
 0x216   :  { %2103 = vmatprep.subr.bf16.mxu1 %v3219_v40 }
 0x219   :  { %2104 = vmatpush2.bf16.msra.mxu1 %v3217_v41 }
 0x21a   :  { %2105 = vmatprep.subr.bf16.mxu1 %v3222_v42 }
 0x21d   :  { %2106 = vmatpush2.bf16.msra.mxu1 %v3220_v43 }
 0x21e   :  { %2803 = vmatprep.subr.bf16.mxu1 %v3239_v49 }
 0x220   :  { %2108 = vmatmul.mubr.bf16.vlgmr.msra.gmra.mxu1 %v4073_v60  ;;  %v3251_v60 = vld [vmem:[%s4284_s7 + $0xc8] sm:$0xff]  }
 0x221   :  { %2804 = vmatpush3.bf16.msra.mxu1 %v3240_v50 }
 0x222   :  { %2805 = vmatprep.subr.bf16.mxu1 %v3241_v51 }
 0x225   :  { %2806 = vmatpush3.bf16.msra.mxu1 %v3242_v52 }
 0x226   :  { %2807 = vmatprep.subr.bf16.mxu1 %v3243_v53 }
 0x229   :  { %2808 = vmatpush3.bf16.msra.mxu1 %v3244_v38 }
 0x22a   :  { %2809 = vmatprep.subr.bf16.mxu1 %v3245_v45 }
 0x22d   :  { %2810 = vmatpush3.bf16.msra.mxu1 %v3246_v54 }
 0x22e   :  { %2811 = vmatprep.subr.bf16.mxu1 %v3247_v55 }
 0x231   :  { %2812 = vmatpush3.bf16.msra.mxu1 %v3248_v56 }
 0x232   :  { %2813 = vmatprep.subr.bf16.mxu1 %v3249_v57 }
 0x235   :  { %2814 = vmatpush3.bf16.msra.mxu1 %v3250_v58 }
 0x236   :  { %2815 = vmatprep.subr.bf16.mxu1 %v3251_v60 }
 0x239   :  { %2816 = vmatpush3.bf16.msra.mxu1 %v3252_v61 }
 0x23a   :  { %2817 = vmatprep.subr.bf16.mxu1 %v3253_v0 }
 0x23d   :  { %2818 = vmatpush3.bf16.msra.mxu1 %v3254_v1 }
 0x260   :  { %v1986_v59 = vpop.f32.mrf.mxu0 }
 0x261   :  { %v1987_v6 = vadd.f32 %v1986_v59, %v1295_v4 }
 0x262   :  { %v1988_v62 = vpop.f32.mrf.mxu0 }
 0x263   :  { %v1989_v9 = vadd.f32 %v1988_v62, %v1299_v5 }
 0x264   :  { %v1990_v63 = vpop.f32.mrf.mxu0 }
 0x266   :  { %v1991_v2 = vpop.f32.mrf.mxu0 }
 0x2a0   :  { %v2027_v7 = vpop.f32.mrf.mxu1  ;;  %v2068_v8 = vpop.f32.mrf.mxu0 }
 0x2a1   :  { %v2028_v10 = vadd.f32 %v2027_v7, %v1987_v6  ;;  %v2069_v26 = vadd.f32 %v2068_v8, %v1303_v15 }
 0x2a2   :  { %v2029_v11 = vpop.f32.mrf.mxu1  ;;  %v2070_v12 = vpop.f32.mrf.mxu0 }
 0x2a3   :  { %v2030_v13 = vadd.f32 %v2029_v11, %v1989_v9  ;;  %v2116_v14 = vmax.f32 %v2028_v10, 0.0  ;;  %v2071_v28 = vadd.f32 %v2070_v12, %v1307_v18 }
 0x2a4   :  { %v2031_v17 = vpop.f32.mrf.mxu1  ;;  %v2072_v20 = vpop.f32.mrf.mxu0 }
 0x2a5   :  { %v2117_v21 = vmax.f32 %v2030_v13, 0.0  ;;  %v2120_v25 = vpack.c.bf16 %v2116_v14, %v2116_v14 }
 0x2a6   :  { %v2032_v22 = vpop.f32.mrf.mxu1  ;;  %v2073_v23 = vpop.f32.mrf.mxu0 }
 0x2a7   :  { %v2121_v24 = vpack.c.bf16 %v2117_v21, %v2117_v21 }
 0x2a9   :  { %2419 = vmatprep.mubr.bf16.mxu0 %v2121_v24 }
 0x2aa   :  { %2420 = vmatmul.mubr.bf16.vlgmr.msra.gmra.mxu0 %v2120_v25 }
 0x2e0   :  { %v2109_v27 = vpop.f32.mrf.mxu1 }
 0x2e1   :  { %v2110_v29 = vadd.f32 %v2109_v27, %v2069_v26 }
 0x2e2   :  { %v2111_v30 = vpop.f32.mrf.mxu1 }
 0x2e3   :  { %v2112_v31 = vadd.f32 %v2111_v30, %v2071_v28  ;;  %v2118_v32 = vmax.f32 %v2110_v29, 0.0 }
 0x2e4   :  { %v2113_v33 = vpop.f32.mrf.mxu1 }
 0x2e5   :  { %v2119_v34 = vmax.f32 %v2112_v31, 0.0  ;;  %v2122_v37 = vpack.c.bf16 %v2118_v32, %v2118_v32 }
 0x2e6   :  { %v2114_v35 = vpop.f32.mrf.mxu1 }
 0x2e7   :  { %v2123_v36 = vpack.c.bf16 %v2119_v34, %v2119_v34 }
 0x2e9   :  { %2459 = vmatprep.mubr.bf16.mxu1 %v2123_v36 }
 0x2ea   :  { %2460 = vmatmul.mubr.bf16.vlgmr.msra.gmra.mxu1 %v2122_v37 }
 0x36a   :  { %v2797_v39 = vpop.f32.mrf.mxu0 }
 0x36c   :  { %v2798_v40 = vpop.f32.mrf.mxu0 }
 0x36d   :  { %v2799_v42 = vadd.f32 %v2798_v40, %v2797_v39 }
 0x36e   :  { %v2800_v41 = vpop.f32.mrf.mxu0 }
 0x36f   :  { %v2422_v46 = vadd.f32 %v2799_v42, %v2748_v19 }
 0x370   :  { %v2801_v16 = vpop.f32.mrf.mxu0 }
 0x3aa   :  { %v2819_v43 = vpop.f32.mrf.mxu1 }
 0x3ac   :  { %v2820_v44 = vpop.f32.mrf.mxu1 }
 0x3ad   :  { %v2821_v47 = vadd.f32 %v2820_v44, %v2819_v43 }
 0x3ae   :  { %v2822_v48 = vpop.f32.mrf.mxu1 }
 0x3af   :  { %v2462_v49 = vadd.f32 %v2821_v47, %v2422_v46 }
 0x3b0   :  { %v2823_v50 = vpop.f32.mrf.mxu1 }
 0x3b1   :  { %2467 = vst [vmem:[#allocation2] sm:$0xff] %v2462_v49 }
 0x3b2   :  { %3266 = shalt.err (!%p3263_p4)
}
 0x3b3   :  { %2477 = dma.vmem_to_hbm [thread:$0]  %s2475_s17, 128, %s4286_s9, [#allocation3]  }
 0x3b4   :  { %3275 = dma.done.wait [#allocation3], 128  }
 0x3b5   :  { %3276 = vsyncadd [#allocation3], 4294967168 }
 0x3b6   :  { %2481 = vsyncpa [#allocation3], 1 }

</bundles_post_ra>
